<compile_context>
chip_gen: v7x
topology: tpu7x:2x2x1
jax: 0.10.0
libtpu: 0.0.40
codegen_flags: <defaults>
</compile_context>

<pallas_src>
import numpy as np
import jax
import jax.numpy as jnp
from jax import lax
from jax.experimental import pallas as pl
from jax.experimental.pallas import tpu as pltpu  # noqa: F401  (TPU backend)


# ----------------------------------------------------------------------------
# small helpers
# ----------------------------------------------------------------------------
def _round_up(x, m):
    return ((x + m - 1) // m) * m


def _f32dot(a, b):
    return jnp.dot(a, b, preferred_element_type=jnp.float32)


def _dot_tA(a, b):
    # a^T @ b without an explicit transpose: contract dim 0 of both operands.
    return lax.dot_general(a, b, (((0,), (0,)), ((), ())),
                           preferred_element_type=jnp.float32)


# ----------------------------------------------------------------------------
# static plan (all Python / numpy; runs at trace time)
# ----------------------------------------------------------------------------
def _range_of(idx):
    a = np.asarray(idx)
    assert a.ndim == 1 and a.size > 0, "empty node-type index set"
    assert np.all(np.diff(a) == 1), \
        "node_cnt index sets must be contiguous ascending ranges"
    return int(a[0]), int(a.shape[0])


def build_plan(args):
    types = []
    for n, rels in args.nt_rel.items():
        off_n, size_n = _range_of(args.node_cnt[n])
        rel_entries = []
        for j, rel in enumerate(rels):
            t1 = rel.split('-')[1]
            t2 = rel.split('-')[-1]
            t1_off, t1_size = _range_of(args.node_cnt[t1])
            t2_off, t2_size = _range_of(args.node_cnt[t2])
            rel_entries.append(dict(name=rel, j=j,
                                    t1_off=t1_off, t1_size=t1_size,
                                    t2_name=t2, t2_off=t2_off,
                                    t2_size=t2_size))
        types.append(dict(name=n, off=off_n, size=size_n, rels=rel_entries))

    # non-overlap check (needed for static row-assembly by concatenation)
    spans = sorted((t['off'], t['off'] + t['size']) for t in types)
    for (a0, a1), (b0, b1) in zip(spans, spans[1:]):
        assert a1 <= b0, "node-type ranges must not overlap"

    use_embs1 = args.dataset in ['ACM']

    # layer-2 / FC only for types whose rows survive the [0, node_num) crop
    # (and only on the non-ACM path).
    l2_types = [] if use_embs1 else \
        [t for t in types if t['off'] < args.node_num]

    # layer-1 only for types actually read downstream.
    needed_l1 = set()
    for t in l2_types:
        for r in t['rels']:
            needed_l1.add(r['t2_name'])
    if use_embs1:
        for t in types:
            if t['off'] < args.node_num:
                needed_l1.add(t['name'])
    l1_types = [t for t in types if t['name'] in needed_l1]

    # unique adjacency operands (a relation may be live at both layers)
    adj_keys = []
    for t in l1_types:
        for r in t['rels']:
            adj_keys.append((t['name'], r['j']))
    for t in l2_types:
        for r in t['rels']:
            if (t['name'], r['j']) not in adj_keys:
                adj_keys.append((t['name'], r['j']))

    het_dim = args.hid_units if use_embs1 else args.out_ft
    out_w = max(128, _round_up(het_dim + args.out_ft, 128))

    return dict(types=types, l1_types=l1_types, l2_types=l2_types,
                adj_keys=adj_keys, use_embs1=use_embs1,
                het_dim=het_dim, out_w=out_w)


# ----------------------------------------------------------------------------
# the single fused kernel
# ----------------------------------------------------------------------------
def make_fused_kernel(plan, hp):
    l1_types = plan['l1_types']
    l2_types = plan['l2_types']
    adj_keys = plan['adj_keys']
    use_embs1 = plan['use_embs1']
    het_dim = plan['het_dim']
    out_w = plan['out_w']

    hid = hp['hid']
    hid2 = hp['hid2']
    out_ft = hp['out_ft']
    node_size = hp['node_size']
    node_num = hp['node_num']
    coe2 = hp['coe2']
    alpha = hp['alpha']

    # static column maps into the packed weight matrices
    w0_col = {}
    c = 0
    for t in l1_types:
        for r in t['rels']:
            w0_col[(t['name'], r['j'])] = c
            c += hid
    w1_col = {}
    c = 0
    for t in l2_types:
        for r in t['rels']:
            w1_col[(t['name'], r['j'])] = c
            c += hid2

    def assemble_rows(blocks, total_rows, width):
        # blocks: [(row_offset, value)], non-overlapping; gaps -> zeros.
        parts = []
        cur = 0
        for off, val in sorted(blocks, key=lambda b: b[0]):
            if off > cur:
                parts.append(jnp.zeros((off - cur, width), jnp.float32))
            parts.append(val)
            cur = off + val.shape[0]
        if cur < total_rows:
            parts.append(jnp.zeros((total_rows - cur, width), jnp.float32))
        return parts[0] if len(parts) == 1 else jnp.concatenate(parts, axis=0)

    def kernel(*refs):
        it = iter(refs)
        feat_ref = next(it)
        adj_refs = {k: next(it) for k in adj_keys}
        dist_ref = next(it)
        w0_ref = next(it) if l1_types else None
        if l2_types:
            w1_ref = next(it)
            fcwsum_ref = next(it)
            fcb_ref = next(it)
        featw_ref = next(it)
        mlpb_ref = next(it)
        out_ref = next(it)

        feats = feat_ref[...]                           # (node_size, ft) f32

        # ---------------- layer 1 (only live types) ----------------
        embs1 = {}
        if l1_types:
            # (A @ X) @ W0  ==  A @ (X @ W0); one fused X @ W0_all matmul.
            z0 = _f32dot(feats, w0_ref[...])            # (node_size, R1*hid)
            for t in l1_types:
                acc = None
                for r in t['rels']:
                    col = w0_col[(t['name'], r['j'])]
                    zsrc = z0[r['t1_off']:r['t1_off'] + r['t1_size'],
                              col:col + hid]
                    a = adj_refs[(t['name'], r['j'])][...].astype(jnp.float32)
                    v = jnp.maximum(_f32dot(a, zsrc), 0.0)
                    acc = v if acc is None else acc + v
                embs1[t['name']] = acc * (1.0 / len(t['rels']))

        # ------- fused feature-side matmul: FC feature halves + MLP -------
        feats_head = feats[0:node_num, :]
        featmm = _f32dot(feats_head, featw_ref[...])    # (node_num,(T2+1)*of)
        n_fc = len(l2_types)
        emb_f = featmm[:, n_fc * out_ft:(n_fc + 1) * out_ft] + mlpb_ref[...]

        # ---------------- layer 2 + FullyConnect (non-ACM path) -----------
        het_blocks = []
        if use_embs1:
            for t in l1_types:
                lo = t['off']
                hi = min(t['off'] + t['size'], node_num)
                if hi > lo:
                    het_blocks.append((lo, embs1[t['name']][0:hi - lo, :]))
        else:
            embs1_full = assemble_rows(
                [(t['off'], embs1[t['name']]) for t in l1_types],
                node_size, hid)
            z1 = _f32dot(embs1_full, w1_ref[...])       # (node_size, R2*hid2)
            v2_blocks = []
            for t in l2_types:
                acc = None
                for r in t['rels']:
                    col = w1_col[(t['name'], r['j'])]
                    zsrc = z1[r['t2_off']:r['t2_off'] + r['t2_size'],
                              col:col + hid2]
                    a = adj_refs[(t['name'], r['j'])][...].astype(jnp.float32)
                    v = jnp.maximum(_f32dot(a, zsrc), 0.0)
                    acc = v if acc is None else acc + v
                v_sum = acc * (1.0 / len(t['rels']))    # (size_t, hid2)
                hi = min(t['off'] + t['size'], node_num)
                v2_blocks.append((t['off'], v_sum[0:hi - t['off'], :]))
            v2_head = assemble_rows(v2_blocks, node_num, hid2)
            fcsum = _f32dot(v2_head, fcwsum_ref[...])   # (node_num, T2*of)
            fcb = fcb_ref[...]                          # (T2, out_ft)
            for ti, t in enumerate(l2_types):
                lo = t['off']
                hi = min(t['off'] + t['size'], node_num)
                c0 = ti * out_ft
                rows = (fcsum[lo:hi, c0:c0 + out_ft]
                        + featmm[lo:hi, c0:c0 + out_ft]
                        + fcb[ti:ti + 1, :])
                het_blocks.append((lo, rows))
        het_val = assemble_rows(het_blocks, node_num, het_dim)

        # ---------------- homogeneous smoothing (fully in-kernel) ---------
        f = emb_f                                       # (node_num, out_ft)
        res0 = _dot_tA(f, f)                            # (out_ft, out_ft)

        rows_i = lax.broadcasted_iota(jnp.int32, (out_ft, out_ft), 0)
        cols_i = lax.broadcasted_iota(jnp.int32, (out_ft, out_ft), 1)
        cols_1 = lax.broadcasted_iota(jnp.int32, (1, out_ft), 1)
        eye = (rows_i == cols_i).astype(jnp.float32)

        # Gauss-Jordan inverse of (I + coe2 * F^T F); SPD with diagonal >= 1,
        # so no pivoting needed.  Replaces the jnp.linalg.inv XLA glue and the
        # second kernel launch of the previous version.
        a_mat = eye + coe2 * res0
        b_inv = eye
        for kk in range(out_ft):
            rsel = rows_i == kk
            csel = cols_i == kk
            arow = jnp.sum(jnp.where(rsel, a_mat, 0.0), axis=0, keepdims=True)
            brow = jnp.sum(jnp.where(rsel, b_inv, 0.0), axis=0, keepdims=True)
            piv = jnp.sum(jnp.where(cols_1 == kk, arow, 0.0),
                          axis=1, keepdims=True)
            inv_piv = 1.0 / piv
            arow = arow * inv_piv
            brow = brow * inv_piv
            colk = jnp.sum(jnp.where(csel, a_mat, 0.0), axis=1, keepdims=True)
            a_mat = jnp.where(rsel, arow, a_mat - colk * arow)
            b_inv = jnp.where(rsel, brow, b_inv - colk * brow)

        r = _f32dot(b_inv, res0)                        # inv @ (F^T F)
        res = coe2 * f - (coe2 * coe2) * _f32dot(f, r)
        tmp = _dot_tA(f, res)                           # F^T @ res
        dist = dist_ref[...].astype(jnp.float32)        # bf16 storage, f32 math
        hom_val = _f32dot(f, tmp) + (-alpha * 0.5) * _f32dot(dist, res)

        # ---------------- single lane-dense (128-wide) store --------------
        pad_w = out_w - het_dim - out_ft
        pieces = [het_val, hom_val]
        if pad_w > 0:
            pieces.append(jnp.zeros((node_num, pad_w), jnp.float32))
        out_ref[...] = jnp.concatenate(pieces, axis=1)

    return kernel


# ----------------------------------------------------------------------------
# cost estimate (advisory)
# ----------------------------------------------------------------------------
def _estimate_cost(plan, hp, operands, out_shape):
    ns, nn = hp['node_size'], hp['node_num']
    ft, hid, hid2, of = hp['ft'], hp['hid'], hp['hid2'], hp['out_ft']
    flops = 0
    n_r1 = sum(len(t['rels']) for t in plan['l1_types'])
    n_r2 = sum(len(t['rels']) for t in plan['l2_types'])
    if plan['l1_types']:
        flops += 2 * ns * ft * (n_r1 * hid)
        for t in plan['l1_types']:
            for r in t['rels']:
                flops += 2 * t['size'] * r['t1_size'] * hid
    if plan['l2_types']:
        flops += 2 * ns * hid * (n_r2 * hid2)
        for t in plan['l2_types']:
            for r in t['rels']:
                flops += 2 * t['size'] * r['t2_size'] * hid2
        flops += 2 * nn * hid2 * (len(plan['l2_types']) * of)
    flops += 2 * nn * ft * ((len(plan['l2_types']) + 1) * of)     # featmm
    flops += 2 * (3 * nn * of * of + 2 * of ** 3 + nn * nn * of)  # hom path
    bytes_acc = sum(int(np.prod(x.shape)) * x.dtype.itemsize for x in operands)
    bytes_acc += int(np.prod(out_shape.shape)) * 4
    return int(flops), int(bytes_acc)


# ----------------------------------------------------------------------------
# wrapper (packs operands, one pallas_call, splits the packed output)
# ----------------------------------------------------------------------------
class Args:
    pass


def modeler_forward(params, args, graph, features, distance):
    plan = build_plan(args)
    hp = dict(ft=args.ft_size, hid=args.hid_units, hid2=args.hid_units2,
              out_ft=args.out_ft, node_size=args.node_size,
              node_num=args.node_num, coe2=float(1.0 / args.beta),
              alpha=float(args.alpha))

    operands = [features.astype(jnp.float32)]
    # O(N^2) operands stored as bf16 (half the HBM traffic / VMEM footprint);
    # math stays f32 in-kernel.
    for (n, j) in plan['adj_keys']:
        operands.append(graph[n][j].astype(jnp.bfloat16))
    operands.append(distance.astype(jnp.bfloat16))

    if plan['l1_types']:
        w0_all = jnp.concatenate(
            [params['bnn0'][r['name']]
             for t in plan['l1_types'] for r in t['rels']], axis=1)
        operands.append(w0_all)
    if plan['l2_types']:
        w1_all = jnp.concatenate(
            [params['bnn1'][r['name']]
             for t in plan['l2_types'] for r in t['rels']], axis=1)
        fcw_sum_all = jnp.concatenate(
            [params['fc'][t['name']]['w'][0:args.hid_units2, :]
             for t in plan['l2_types']], axis=1)
        fcb_all = jnp.concatenate(
            [params['fc'][t['name']]['b'] for t in plan['l2_types']], axis=0)
        operands += [w1_all, fcw_sum_all, fcb_all]
        featw_all = jnp.concatenate(
            [params['fc'][t['name']]['w'][args.hid_units2:, :]
             for t in plan['l2_types']] + [params['mlp']['w']], axis=1)
    else:
        featw_all = params['mlp']['w']
    operands += [featw_all, params['mlp']['b']]

    out_shape = jax.ShapeDtypeStruct((args.node_num, plan['out_w']),
                                     jnp.float32)
    flops, bytes_acc = _estimate_cost(plan, hp, operands, out_shape)

    out = pl.pallas_call(
        make_fused_kernel(plan, hp),
        out_shape=out_shape,
        cost_estimate=pl.CostEstimate(flops=flops, transcendentals=0,
                                      bytes_accessed=bytes_acc),
    )(*operands)

    het_dim = plan['het_dim']
    embs_het = out[:, 0:het_dim]
    embs_hom = out[:, het_dim:het_dim + args.out_ft]
    return embs_het, embs_hom


# ----------------------------------------------------------------------------
# parameter init
# ----------------------------------------------------------------------------
def glorot(key, shape):
    fan_in, fan_out = shape
    lim = (6.0 / (fan_in + fan_out)) ** 0.5
    return jax.random.uniform(key, shape, jnp.float32, -lim, lim)


def init_params(key, args):
    params = {'bnn0': {}, 'bnn1': {}, 'fc': {}, 'mlp': {}}
    keys = iter(jax.random.split(key, 64))
    for t, rels in args.nt_rel.items():
        for rel in rels:
            params['bnn0'][rel] = glorot(next(keys),
                                         (args.ft_size, args.hid_units))
            params['bnn1'][rel] = glorot(next(keys),
                                         (args.hid_units, args.hid_units2))
        params['fc'][t] = {
            'w': glorot(next(keys),
                        (args.hid_units2 + args.ft_size, args.out_ft)),
            'b': jnp.zeros((1, args.out_ft), jnp.float32),
        }
    params['mlp'] = {
        'w': glorot(next(keys), (args.ft_size, args.out_ft)),
        'b': jnp.zeros((1, args.out_ft), jnp.float32),
    }
    return params


# ----------------------------------------------------------------------------
# pure-JAX reference (mirrors the PyTorch forward) for a correctness check
# ----------------------------------------------------------------------------
def modeler_forward_reference(params, args, graph, features, distance):
    embs1 = jnp.zeros((args.node_size, args.hid_units), jnp.float32)
    embs2 = jnp.zeros((args.node_size, args.out_ft), jnp.float32)
    for n, rels in args.nt_rel.items():
        vecs = []
        for j, rel in enumerate(rels):
            t = rel.split('-')[1]
            mn = graph[n][j] @ features[args.node_cnt[t]]
            vecs.append(jnp.maximum(mn @ params['bnn0'][rel], 0.0))
        embs1 = embs1.at[args.node_cnt[n]].set(jnp.mean(jnp.stack(vecs, 0), 0))
    for n, rels in args.nt_rel.items():
        vecs = []
        for j, rel in enumerate(rels):
            t = rel.split('-')[-1]
            mn = graph[n][j] @ embs1[args.node_cnt[t]]
            vecs.append(jnp.maximum(mn @ params['bnn1'][rel], 0.0))
        v = jnp.mean(jnp.stack(vecs, 0), 0)
        v = jnp.hstack((v, features[args.node_cnt[n]]))
        v = v @ params['fc'][n]['w'] + params['fc'][n]['b']
        embs2 = embs2.at[args.node_cnt[n]].set(v)
    emb_f = (features @ params['mlp']['w'] + params['mlp']['b'])[0:args.node_num]
    embs_het = embs1 if args.dataset in ['ACM'] else embs2
    coe2 = 1.0 / args.beta
    res = emb_f.T @ emb_f
    inv = jnp.linalg.inv(jnp.eye(emb_f.shape[1], dtype=jnp.float32) + coe2 * res)
    res = inv @ res
    res = coe2 * emb_f - coe2 * coe2 * (emb_f @ res)
    tmp = emb_f.T @ res
    embs_all = emb_f @ tmp + (-args.alpha / 2) * (distance @ res)
    return embs_het[0:args.node_num], embs_all[0:args.node_num]


# ----------------------------------------------------------------------------
# main
# ----------------------------------------------------------------------------
if __name__ == "__main__":
    key = jax.random.PRNGKey(0)

    args = Args()
    args.nt_rel = {'p': ['p-a', 'p-s'], 'a': ['a-p'], 's': ['s-p']}
    n_p, n_a, n_s = 8, 8, 8
    args.node_cnt = {
        'p': jnp.arange(0, n_p),
        'a': jnp.arange(n_p, n_p + n_a),
        's': jnp.arange(n_p + n_a, n_p + n_a + n_s),
    }
    args.node_size = n_p + n_a + n_s           # 24
    args.node_num = n_p                        # 8 (target-type nodes)
    args.ft_size = 32
    args.hid_units = 16
    args.hid_units2 = 16
    args.out_ft = 16
    args.beta = 2.0
    args.alpha = 0.5
    args.dataset = 'DBLP'                      # not 'ACM' -> embs_het = embs2

    k_feat, k_dist, k_g, k_par = jax.random.split(key, 4)
    features = jax.random.normal(
        k_feat, (args.node_size, args.ft_size), jnp.float32)
    distance = jax.random.normal(
        k_dist, (args.node_num, args.node_num), jnp.float32)

    # dense, row-normalized adjacency matrices standing in for torch.spmm
    def rand_adj(k, rows, cols):
        a = (jax.random.uniform(k, (rows, cols)) > 0.5).astype(jnp.float32)
        a = a + 1e-3
        return a / jnp.sum(a, axis=1, keepdims=True)

    kg = iter(jax.random.split(k_g, 8))
    sizes = {'p': n_p, 'a': n_a, 's': n_s}
    graph = {}
    for n, rels in args.nt_rel.items():
        graph[n] = []
        for rel in rels:
            t = rel.split('-')[1]
            graph[n].append(rand_adj(next(kg), sizes[n], sizes[t]))

    params = init_params(k_par, args)

    fwd = jax.jit(lambda p, g, f, d: modeler_forward(p, args, g, f, d))
    embs_het, embs_hom = fwd(params, graph, features, distance)
    jax.block_until_ready(embs_het)
    jax.block_until_ready(embs_hom)

    assert embs_het.shape == (args.node_num, args.out_ft)
    assert embs_hom.shape == (args.node_num, args.out_ft)

    ref_het, ref_hom = modeler_forward_reference(
        params, args, graph, features, distance)
    tol = 2e-2
    assert float(jnp.max(jnp.abs(embs_het - ref_het))) <= \
        tol * (1.0 + float(jnp.max(jnp.abs(ref_het))))
    assert float(jnp.max(jnp.abs(embs_hom - ref_hom))) <= \
        tol * (1.0 + float(jnp.max(jnp.abs(ref_hom))))

    print("KERNEL_OK")
</pallas_src>

<mosaic_0001>
module attributes {stable_mosaic.version = 11 : i64} {
  func.func @kernel(%arg0: memref<24x32xf32, #tpu.memory_space<vmem>>, %arg1: memref<8x8xbf16, #tpu.memory_space<vmem>>, %arg2: memref<8x8xbf16, #tpu.memory_space<vmem>>, %arg3: memref<8x8xbf16, #tpu.memory_space<vmem>>, %arg4: memref<8x8xbf16, #tpu.memory_space<vmem>>, %arg5: memref<8x8xbf16, #tpu.memory_space<vmem>>, %arg6: memref<32x32xf32, #tpu.memory_space<vmem>>, %arg7: memref<16x32xf32, #tpu.memory_space<vmem>>, %arg8: memref<16x16xf32, #tpu.memory_space<vmem>>, %arg9: memref<1x16xf32, #tpu.memory_space<vmem>>, %arg10: memref<32x32xf32, #tpu.memory_space<vmem>>, %arg11: memref<1x16xf32, #tpu.memory_space<vmem>>, %arg12: memref<8x128xf32, #tpu.memory_space<vmem>>) attributes {dimension_semantics = [], scalar_prefetch = 0 : i64, scratch_operands = 0 : i64, tpu.core_type = #tpu.core_type<tc>} {
    %c0 = arith.constant 0 : index
    %c0_0 = arith.constant 0 : index
    %0 = vector.load %arg0[%c0, %c0_0] : memref<24x32xf32, #tpu.memory_space<vmem>>, vector<24x32xf32>
    %c0_1 = arith.constant 0 : index
    %c0_2 = arith.constant 0 : index
    %1 = vector.load %arg6[%c0_1, %c0_2] : memref<32x32xf32, #tpu.memory_space<vmem>>, vector<32x32xf32>
    %cst = arith.constant dense<0.000000e+00> : vector<24x32xf32>
    %2 = tpu.matmul %0, %1, %cst {dimension_numbers = #tpu.dot_dimension_numbers<[1], [0], [0], [1], [0, 0, 1, 1], [], []>} : vector<24x32xf32>, vector<32x32xf32>, vector<24x32xf32> -> vector<24x32xf32>
    %3 = vector.extract_strided_slice %2 {offsets = [0, 0], sizes = [8, 16], strides = [1, 1]} : vector<24x32xf32> to vector<8x16xf32>
    %c0_3 = arith.constant 0 : index
    %c0_4 = arith.constant 0 : index
    %4 = vector.load %arg1[%c0_3, %c0_4] : memref<8x8xbf16, #tpu.memory_space<vmem>>, vector<8x8xbf16>
    %5 = arith.extf %4 : vector<8x8xbf16> to vector<8x8xf32>
    %cst_5 = arith.constant dense<0.000000e+00> : vector<8x16xf32>
    %6 = tpu.matmul %5, %3, %cst_5 {dimension_numbers = #tpu.dot_dimension_numbers<[1], [0], [0], [1], [0, 0, 1, 1], [], []>} : vector<8x8xf32>, vector<8x16xf32>, vector<8x16xf32> -> vector<8x16xf32>
    %cst_6 = arith.constant 0.000000e+00 : f32
    %7 = vector.broadcast %cst_6 : f32 to vector<8x16xf32>
    %8 = arith.maximumf %6, %7 : vector<8x16xf32>
    %cst_7 = arith.constant 1.000000e+00 : f32
    %9 = vector.broadcast %cst_7 : f32 to vector<8x16xf32>
    %10 = arith.mulf %8, %9 : vector<8x16xf32>
    %11 = vector.extract_strided_slice %2 {offsets = [0, 16], sizes = [8, 16], strides = [1, 1]} : vector<24x32xf32> to vector<8x16xf32>
    %c0_8 = arith.constant 0 : index
    %c0_9 = arith.constant 0 : index
    %12 = vector.load %arg2[%c0_8, %c0_9] : memref<8x8xbf16, #tpu.memory_space<vmem>>, vector<8x8xbf16>
    %13 = arith.extf %12 : vector<8x8xbf16> to vector<8x8xf32>
    %cst_10 = arith.constant dense<0.000000e+00> : vector<8x16xf32>
    %14 = tpu.matmul %13, %11, %cst_10 {dimension_numbers = #tpu.dot_dimension_numbers<[1], [0], [0], [1], [0, 0, 1, 1], [], []>} : vector<8x8xf32>, vector<8x16xf32>, vector<8x16xf32> -> vector<8x16xf32>
    %cst_11 = arith.constant 0.000000e+00 : f32
    %15 = vector.broadcast %cst_11 : f32 to vector<8x16xf32>
    %16 = arith.maximumf %14, %15 : vector<8x16xf32>
    %cst_12 = arith.constant 1.000000e+00 : f32
    %17 = vector.broadcast %cst_12 : f32 to vector<8x16xf32>
    %18 = arith.mulf %16, %17 : vector<8x16xf32>
    %19 = vector.extract_strided_slice %0 {offsets = [0, 0], sizes = [8, 32], strides = [1, 1]} : vector<24x32xf32> to vector<8x32xf32>
    %c0_13 = arith.constant 0 : index
    %c0_14 = arith.constant 0 : index
    %20 = vector.load %arg10[%c0_13, %c0_14] : memref<32x32xf32, #tpu.memory_space<vmem>>, vector<32x32xf32>
    %cst_15 = arith.constant dense<0.000000e+00> : vector<8x32xf32>
    %21 = tpu.matmul %19, %20, %cst_15 {dimension_numbers = #tpu.dot_dimension_numbers<[1], [0], [0], [1], [0, 0, 1, 1], [], []>} : vector<8x32xf32>, vector<32x32xf32>, vector<8x32xf32> -> vector<8x32xf32>
    %22 = vector.extract_strided_slice %21 {offsets = [0, 16], sizes = [8, 16], strides = [1, 1]} : vector<8x32xf32> to vector<8x16xf32>
    %c0_16 = arith.constant 0 : index
    %c0_17 = arith.constant 0 : index
    %23 = vector.load %arg11[%c0_16, %c0_17] : memref<1x16xf32, #tpu.memory_space<vmem>>, vector<1x16xf32>
    %24 = vector.broadcast %23 : vector<1x16xf32> to vector<8x16xf32>
    %25 = arith.addf %22, %24 : vector<8x16xf32>
    %cst_18 = arith.constant 0.000000e+00 : f32
    %26 = vector.broadcast %cst_18 : f32 to vector<8x16xf32>
    %27 = tpu.concatenate %26, %10, %18 in 0 : vector<8x16xf32>, vector<8x16xf32>, vector<8x16xf32> -> vector<24x16xf32>
    %c0_19 = arith.constant 0 : index
    %c0_20 = arith.constant 0 : index
    %28 = vector.load %arg7[%c0_19, %c0_20] : memref<16x32xf32, #tpu.memory_space<vmem>>, vector<16x32xf32>
    %cst_21 = arith.constant dense<0.000000e+00> : vector<24x32xf32>
    %29 = tpu.matmul %27, %28, %cst_21 {dimension_numbers = #tpu.dot_dimension_numbers<[1], [0], [0], [1], [0, 0, 1, 1], [], []>} : vector<24x16xf32>, vector<16x32xf32>, vector<24x32xf32> -> vector<24x32xf32>
    %30 = vector.extract_strided_slice %29 {offsets = [8, 0], sizes = [8, 16], strides = [1, 1]} : vector<24x32xf32> to vector<8x16xf32>
    %c0_22 = arith.constant 0 : index
    %c0_23 = arith.constant 0 : index
    %31 = vector.load %arg3[%c0_22, %c0_23] : memref<8x8xbf16, #tpu.memory_space<vmem>>, vector<8x8xbf16>
    %32 = arith.extf %31 : vector<8x8xbf16> to vector<8x8xf32>
    %cst_24 = arith.constant dense<0.000000e+00> : vector<8x16xf32>
    %33 = tpu.matmul %32, %30, %cst_24 {dimension_numbers = #tpu.dot_dimension_numbers<[1], [0], [0], [1], [0, 0, 1, 1], [], []>} : vector<8x8xf32>, vector<8x16xf32>, vector<8x16xf32> -> vector<8x16xf32>
    %cst_25 = arith.constant 0.000000e+00 : f32
    %34 = vector.broadcast %cst_25 : f32 to vector<8x16xf32>
    %35 = arith.maximumf %33, %34 : vector<8x16xf32>
    %36 = vector.extract_strided_slice %29 {offsets = [16, 16], sizes = [8, 16], strides = [1, 1]} : vector<24x32xf32> to vector<8x16xf32>
    %c0_26 = arith.constant 0 : index
    %c0_27 = arith.constant 0 : index
    %37 = vector.load %arg4[%c0_26, %c0_27] : memref<8x8xbf16, #tpu.memory_space<vmem>>, vector<8x8xbf16>
    %38 = arith.extf %37 : vector<8x8xbf16> to vector<8x8xf32>
    %cst_28 = arith.constant dense<0.000000e+00> : vector<8x16xf32>
    %39 = tpu.matmul %38, %36, %cst_28 {dimension_numbers = #tpu.dot_dimension_numbers<[1], [0], [0], [1], [0, 0, 1, 1], [], []>} : vector<8x8xf32>, vector<8x16xf32>, vector<8x16xf32> -> vector<8x16xf32>
    %cst_29 = arith.constant 0.000000e+00 : f32
    %40 = vector.broadcast %cst_29 : f32 to vector<8x16xf32>
    %41 = arith.maximumf %39, %40 : vector<8x16xf32>
    %42 = arith.addf %35, %41 : vector<8x16xf32>
    %cst_30 = arith.constant 5.000000e-01 : f32
    %43 = vector.broadcast %cst_30 : f32 to vector<8x16xf32>
    %44 = arith.mulf %42, %43 : vector<8x16xf32>
    %c0_31 = arith.constant 0 : index
    %c0_32 = arith.constant 0 : index
    %45 = vector.load %arg8[%c0_31, %c0_32] : memref<16x16xf32, #tpu.memory_space<vmem>>, vector<16x16xf32>
    %cst_33 = arith.constant dense<0.000000e+00> : vector<8x16xf32>
    %46 = tpu.matmul %44, %45, %cst_33 {dimension_numbers = #tpu.dot_dimension_numbers<[1], [0], [0], [1], [0, 0, 1, 1], [], []>} : vector<8x16xf32>, vector<16x16xf32>, vector<8x16xf32> -> vector<8x16xf32>
    %c0_34 = arith.constant 0 : index
    %c0_35 = arith.constant 0 : index
    %47 = vector.load %arg9[%c0_34, %c0_35] : memref<1x16xf32, #tpu.memory_space<vmem>>, vector<1x16xf32>
    %48 = vector.extract_strided_slice %21 {offsets = [0, 0], sizes = [8, 16], strides = [1, 1]} : vector<8x32xf32> to vector<8x16xf32>
    %49 = arith.addf %46, %48 : vector<8x16xf32>
    %50 = vector.broadcast %47 : vector<1x16xf32> to vector<8x16xf32>
    %51 = arith.addf %49, %50 : vector<8x16xf32>
    %cst_36 = arith.constant dense<0.000000e+00> : vector<16x16xf32>
    %52 = tpu.matmul %25, %25, %cst_36 {dimension_numbers = #tpu.dot_dimension_numbers<[0], [0], [1], [1], [0, 1, 1, 1], [], []>} : vector<8x16xf32>, vector<8x16xf32>, vector<16x16xf32> -> vector<16x16xf32>
    %53 = tpu.iota {dimensions = array<i32: 0>} : vector<16x16xi32>
    %54 = tpu.iota {dimensions = array<i32: 1>} : vector<16x16xi32>
    %55 = tpu.iota {dimensions = array<i32: 1>} : vector<1x16xi32>
    %56 = arith.cmpi eq, %53, %54 : vector<16x16xi32>
    %57 = arith.extui %56 : vector<16x16xi1> to vector<16x16xi32>
    %58 = arith.sitofp %57 : vector<16x16xi32> to vector<16x16xf32>
    %cst_37 = arith.constant 5.000000e-01 : f32
    %59 = vector.broadcast %cst_37 : f32 to vector<16x16xf32>
    %60 = arith.mulf %59, %52 : vector<16x16xf32>
    %61 = arith.addf %58, %60 : vector<16x16xf32>
    %c0_i32 = arith.constant 0 : i32
    %62 = vector.broadcast %c0_i32 : i32 to vector<16x16xi32>
    %63 = arith.cmpi eq, %53, %62 : vector<16x16xi32>
    %c0_i32_38 = arith.constant 0 : i32
    %64 = vector.broadcast %c0_i32_38 : i32 to vector<16x16xi32>
    %65 = arith.cmpi eq, %54, %64 : vector<16x16xi32>
    %cst_39 = arith.constant 0.000000e+00 : f32
    %66 = vector.broadcast %cst_39 : f32 to vector<16x16xf32>
    %67 = arith.select %63, %61, %66 : vector<16x16xi1>, vector<16x16xf32>
    %cst_40 = arith.constant dense<0.000000e+00> : vector<16xf32>
    %68 = vector.multi_reduction <add>, %67, %cst_40 [0] : vector<16x16xf32> to vector<16xf32>
    %69 = vector.shape_cast %68 : vector<16xf32> to vector<1x16xf32>
    %cst_41 = arith.constant 0.000000e+00 : f32
    %70 = vector.broadcast %cst_41 : f32 to vector<16x16xf32>
    %71 = arith.select %63, %58, %70 : vector<16x16xi1>, vector<16x16xf32>
    %cst_42 = arith.constant dense<0.000000e+00> : vector<16xf32>
    %72 = vector.multi_reduction <add>, %71, %cst_42 [0] : vector<16x16xf32> to vector<16xf32>
    %73 = vector.shape_cast %72 : vector<16xf32> to vector<1x16xf32>
    %c0_i32_43 = arith.constant 0 : i32
    %74 = vector.broadcast %c0_i32_43 : i32 to vector<1x16xi32>
    %75 = arith.cmpi eq, %55, %74 : vector<1x16xi32>
    %cst_44 = arith.constant 0.000000e+00 : f32
    %76 = vector.broadcast %cst_44 : f32 to vector<1x16xf32>
    %77 = arith.select %75, %69, %76 : vector<1x16xi1>, vector<1x16xf32>
    %cst_45 = arith.constant dense<0.000000e+00> : vector<1xf32>
    %78 = vector.multi_reduction <add>, %77, %cst_45 [1] : vector<1x16xf32> to vector<1xf32>
    %79 = vector.shape_cast %78 : vector<1xf32> to vector<1x1xf32>
    %cst_46 = arith.constant 1.000000e+00 : f32
    %80 = vector.broadcast %cst_46 : f32 to vector<1x1xf32>
    %81 = arith.divf %80, %79 : vector<1x1xf32>
    %82 = vector.broadcast %81 : vector<1x1xf32> to vector<1x16xf32>
    %83 = arith.mulf %69, %82 : vector<1x16xf32>
    %84 = vector.broadcast %81 : vector<1x1xf32> to vector<1x16xf32>
    %85 = arith.mulf %73, %84 : vector<1x16xf32>
    %cst_47 = arith.constant 0.000000e+00 : f32
    %86 = vector.broadcast %cst_47 : f32 to vector<16x16xf32>
    %87 = arith.select %65, %61, %86 : vector<16x16xi1>, vector<16x16xf32>
    %cst_48 = arith.constant dense<0.000000e+00> : vector<16xf32>
    %88 = vector.multi_reduction <add>, %87, %cst_48 [1] : vector<16x16xf32> to vector<16xf32>
    %89 = vector.shape_cast %88 : vector<16xf32> to vector<16x1xf32>
    %90 = vector.broadcast %89 : vector<16x1xf32> to vector<16x16xf32>
    %91 = vector.broadcast %83 : vector<1x16xf32> to vector<16x16xf32>
    %92 = arith.mulf %90, %91 : vector<16x16xf32>
    %93 = arith.subf %61, %92 : vector<16x16xf32>
    %94 = vector.shape_cast %83 : vector<1x16xf32> to vector<1x16xf32>
    %95 = vector.broadcast %94 : vector<1x16xf32> to vector<16x16xf32>
    %96 = arith.select %63, %95, %93 : vector<16x16xi1>, vector<16x16xf32>
    %97 = vector.broadcast %89 : vector<16x1xf32> to vector<16x16xf32>
    %98 = vector.broadcast %85 : vector<1x16xf32> to vector<16x16xf32>
    %99 = arith.mulf %97, %98 : vector<16x16xf32>
    %100 = arith.subf %58, %99 : vector<16x16xf32>
    %101 = vector.shape_cast %85 : vector<1x16xf32> to vector<1x16xf32>
    %102 = vector.broadcast %101 : vector<1x16xf32> to vector<16x16xf32>
    %103 = arith.select %63, %102, %100 : vector<16x16xi1>, vector<16x16xf32>
    %c1_i32 = arith.constant 1 : i32
    %104 = vector.broadcast %c1_i32 : i32 to vector<16x16xi32>
    %105 = arith.cmpi eq, %53, %104 : vector<16x16xi32>
    %c1_i32_49 = arith.constant 1 : i32
    %106 = vector.broadcast %c1_i32_49 : i32 to vector<16x16xi32>
    %107 = arith.cmpi eq, %54, %106 : vector<16x16xi32>
    %cst_50 = arith.constant 0.000000e+00 : f32
    %108 = vector.broadcast %cst_50 : f32 to vector<16x16xf32>
    %109 = arith.select %105, %96, %108 : vector<16x16xi1>, vector<16x16xf32>
    %cst_51 = arith.constant dense<0.000000e+00> : vector<16xf32>
    %110 = vector.multi_reduction <add>, %109, %cst_51 [0] : vector<16x16xf32> to vector<16xf32>
    %111 = vector.shape_cast %110 : vector<16xf32> to vector<1x16xf32>
    %cst_52 = arith.constant 0.000000e+00 : f32
    %112 = vector.broadcast %cst_52 : f32 to vector<16x16xf32>
    %113 = arith.select %105, %103, %112 : vector<16x16xi1>, vector<16x16xf32>
    %cst_53 = arith.constant dense<0.000000e+00> : vector<16xf32>
    %114 = vector.multi_reduction <add>, %113, %cst_53 [0] : vector<16x16xf32> to vector<16xf32>
    %115 = vector.shape_cast %114 : vector<16xf32> to vector<1x16xf32>
    %c1_i32_54 = arith.constant 1 : i32
    %116 = vector.broadcast %c1_i32_54 : i32 to vector<1x16xi32>
    %117 = arith.cmpi eq, %55, %116 : vector<1x16xi32>
    %cst_55 = arith.constant 0.000000e+00 : f32
    %118 = vector.broadcast %cst_55 : f32 to vector<1x16xf32>
    %119 = arith.select %117, %111, %118 : vector<1x16xi1>, vector<1x16xf32>
    %cst_56 = arith.constant dense<0.000000e+00> : vector<1xf32>
    %120 = vector.multi_reduction <add>, %119, %cst_56 [1] : vector<1x16xf32> to vector<1xf32>
    %121 = vector.shape_cast %120 : vector<1xf32> to vector<1x1xf32>
    %cst_57 = arith.constant 1.000000e+00 : f32
    %122 = vector.broadcast %cst_57 : f32 to vector<1x1xf32>
    %123 = arith.divf %122, %121 : vector<1x1xf32>
    %124 = vector.broadcast %123 : vector<1x1xf32> to vector<1x16xf32>
    %125 = arith.mulf %111, %124 : vector<1x16xf32>
    %126 = vector.broadcast %123 : vector<1x1xf32> to vector<1x16xf32>
    %127 = arith.mulf %115, %126 : vector<1x16xf32>
    %cst_58 = arith.constant 0.000000e+00 : f32
    %128 = vector.broadcast %cst_58 : f32 to vector<16x16xf32>
    %129 = arith.select %107, %96, %128 : vector<16x16xi1>, vector<16x16xf32>
    %cst_59 = arith.constant dense<0.000000e+00> : vector<16xf32>
    %130 = vector.multi_reduction <add>, %129, %cst_59 [1] : vector<16x16xf32> to vector<16xf32>
    %131 = vector.shape_cast %130 : vector<16xf32> to vector<16x1xf32>
    %132 = vector.broadcast %131 : vector<16x1xf32> to vector<16x16xf32>
    %133 = vector.broadcast %125 : vector<1x16xf32> to vector<16x16xf32>
    %134 = arith.mulf %132, %133 : vector<16x16xf32>
    %135 = arith.subf %96, %134 : vector<16x16xf32>
    %136 = vector.shape_cast %125 : vector<1x16xf32> to vector<1x16xf32>
    %137 = vector.broadcast %136 : vector<1x16xf32> to vector<16x16xf32>
    %138 = arith.select %105, %137, %135 : vector<16x16xi1>, vector<16x16xf32>
    %139 = vector.broadcast %131 : vector<16x1xf32> to vector<16x16xf32>
    %140 = vector.broadcast %127 : vector<1x16xf32> to vector<16x16xf32>
    %141 = arith.mulf %139, %140 : vector<16x16xf32>
    %142 = arith.subf %103, %141 : vector<16x16xf32>
    %143 = vector.shape_cast %127 : vector<1x16xf32> to vector<1x16xf32>
    %144 = vector.broadcast %143 : vector<1x16xf32> to vector<16x16xf32>
    %145 = arith.select %105, %144, %142 : vector<16x16xi1>, vector<16x16xf32>
    %c2_i32 = arith.constant 2 : i32
    %146 = vector.broadcast %c2_i32 : i32 to vector<16x16xi32>
    %147 = arith.cmpi eq, %53, %146 : vector<16x16xi32>
    %c2_i32_60 = arith.constant 2 : i32
    %148 = vector.broadcast %c2_i32_60 : i32 to vector<16x16xi32>
    %149 = arith.cmpi eq, %54, %148 : vector<16x16xi32>
    %cst_61 = arith.constant 0.000000e+00 : f32
    %150 = vector.broadcast %cst_61 : f32 to vector<16x16xf32>
    %151 = arith.select %147, %138, %150 : vector<16x16xi1>, vector<16x16xf32>
    %cst_62 = arith.constant dense<0.000000e+00> : vector<16xf32>
    %152 = vector.multi_reduction <add>, %151, %cst_62 [0] : vector<16x16xf32> to vector<16xf32>
    %153 = vector.shape_cast %152 : vector<16xf32> to vector<1x16xf32>
    %cst_63 = arith.constant 0.000000e+00 : f32
    %154 = vector.broadcast %cst_63 : f32 to vector<16x16xf32>
    %155 = arith.select %147, %145, %154 : vector<16x16xi1>, vector<16x16xf32>
    %cst_64 = arith.constant dense<0.000000e+00> : vector<16xf32>
    %156 = vector.multi_reduction <add>, %155, %cst_64 [0] : vector<16x16xf32> to vector<16xf32>
    %157 = vector.shape_cast %156 : vector<16xf32> to vector<1x16xf32>
    %c2_i32_65 = arith.constant 2 : i32
    %158 = vector.broadcast %c2_i32_65 : i32 to vector<1x16xi32>
    %159 = arith.cmpi eq, %55, %158 : vector<1x16xi32>
    %cst_66 = arith.constant 0.000000e+00 : f32
    %160 = vector.broadcast %cst_66 : f32 to vector<1x16xf32>
    %161 = arith.select %159, %153, %160 : vector<1x16xi1>, vector<1x16xf32>
    %cst_67 = arith.constant dense<0.000000e+00> : vector<1xf32>
    %162 = vector.multi_reduction <add>, %161, %cst_67 [1] : vector<1x16xf32> to vector<1xf32>
    %163 = vector.shape_cast %162 : vector<1xf32> to vector<1x1xf32>
    %cst_68 = arith.constant 1.000000e+00 : f32
    %164 = vector.broadcast %cst_68 : f32 to vector<1x1xf32>
    %165 = arith.divf %164, %163 : vector<1x1xf32>
    %166 = vector.broadcast %165 : vector<1x1xf32> to vector<1x16xf32>
    %167 = arith.mulf %153, %166 : vector<1x16xf32>
    %168 = vector.broadcast %165 : vector<1x1xf32> to vector<1x16xf32>
    %169 = arith.mulf %157, %168 : vector<1x16xf32>
    %cst_69 = arith.constant 0.000000e+00 : f32
    %170 = vector.broadcast %cst_69 : f32 to vector<16x16xf32>
    %171 = arith.select %149, %138, %170 : vector<16x16xi1>, vector<16x16xf32>
    %cst_70 = arith.constant dense<0.000000e+00> : vector<16xf32>
    %172 = vector.multi_reduction <add>, %171, %cst_70 [1] : vector<16x16xf32> to vector<16xf32>
    %173 = vector.shape_cast %172 : vector<16xf32> to vector<16x1xf32>
    %174 = vector.broadcast %173 : vector<16x1xf32> to vector<16x16xf32>
    %175 = vector.broadcast %167 : vector<1x16xf32> to vector<16x16xf32>
    %176 = arith.mulf %174, %175 : vector<16x16xf32>
    %177 = arith.subf %138, %176 : vector<16x16xf32>
    %178 = vector.shape_cast %167 : vector<1x16xf32> to vector<1x16xf32>
    %179 = vector.broadcast %178 : vector<1x16xf32> to vector<16x16xf32>
    %180 = arith.select %147, %179, %177 : vector<16x16xi1>, vector<16x16xf32>
    %181 = vector.broadcast %173 : vector<16x1xf32> to vector<16x16xf32>
    %182 = vector.broadcast %169 : vector<1x16xf32> to vector<16x16xf32>
    %183 = arith.mulf %181, %182 : vector<16x16xf32>
    %184 = arith.subf %145, %183 : vector<16x16xf32>
    %185 = vector.shape_cast %169 : vector<1x16xf32> to vector<1x16xf32>
    %186 = vector.broadcast %185 : vector<1x16xf32> to vector<16x16xf32>
    %187 = arith.select %147, %186, %184 : vector<16x16xi1>, vector<16x16xf32>
    %c3_i32 = arith.constant 3 : i32
    %188 = vector.broadcast %c3_i32 : i32 to vector<16x16xi32>
    %189 = arith.cmpi eq, %53, %188 : vector<16x16xi32>
    %c3_i32_71 = arith.constant 3 : i32
    %190 = vector.broadcast %c3_i32_71 : i32 to vector<16x16xi32>
    %191 = arith.cmpi eq, %54, %190 : vector<16x16xi32>
    %cst_72 = arith.constant 0.000000e+00 : f32
    %192 = vector.broadcast %cst_72 : f32 to vector<16x16xf32>
    %193 = arith.select %189, %180, %192 : vector<16x16xi1>, vector<16x16xf32>
    %cst_73 = arith.constant dense<0.000000e+00> : vector<16xf32>
    %194 = vector.multi_reduction <add>, %193, %cst_73 [0] : vector<16x16xf32> to vector<16xf32>
    %195 = vector.shape_cast %194 : vector<16xf32> to vector<1x16xf32>
    %cst_74 = arith.constant 0.000000e+00 : f32
    %196 = vector.broadcast %cst_74 : f32 to vector<16x16xf32>
    %197 = arith.select %189, %187, %196 : vector<16x16xi1>, vector<16x16xf32>
    %cst_75 = arith.constant dense<0.000000e+00> : vector<16xf32>
    %198 = vector.multi_reduction <add>, %197, %cst_75 [0] : vector<16x16xf32> to vector<16xf32>
    %199 = vector.shape_cast %198 : vector<16xf32> to vector<1x16xf32>
    %c3_i32_76 = arith.constant 3 : i32
    %200 = vector.broadcast %c3_i32_76 : i32 to vector<1x16xi32>
    %201 = arith.cmpi eq, %55, %200 : vector<1x16xi32>
    %cst_77 = arith.constant 0.000000e+00 : f32
    %202 = vector.broadcast %cst_77 : f32 to vector<1x16xf32>
    %203 = arith.select %201, %195, %202 : vector<1x16xi1>, vector<1x16xf32>
    %cst_78 = arith.constant dense<0.000000e+00> : vector<1xf32>
    %204 = vector.multi_reduction <add>, %203, %cst_78 [1] : vector<1x16xf32> to vector<1xf32>
    %205 = vector.shape_cast %204 : vector<1xf32> to vector<1x1xf32>
    %cst_79 = arith.constant 1.000000e+00 : f32
    %206 = vector.broadcast %cst_79 : f32 to vector<1x1xf32>
    %207 = arith.divf %206, %205 : vector<1x1xf32>
    %208 = vector.broadcast %207 : vector<1x1xf32> to vector<1x16xf32>
    %209 = arith.mulf %195, %208 : vector<1x16xf32>
    %210 = vector.broadcast %207 : vector<1x1xf32> to vector<1x16xf32>
    %211 = arith.mulf %199, %210 : vector<1x16xf32>
    %cst_80 = arith.constant 0.000000e+00 : f32
    %212 = vector.broadcast %cst_80 : f32 to vector<16x16xf32>
    %213 = arith.select %191, %180, %212 : vector<16x16xi1>, vector<16x16xf32>
    %cst_81 = arith.constant dense<0.000000e+00> : vector<16xf32>
    %214 = vector.multi_reduction <add>, %213, %cst_81 [1] : vector<16x16xf32> to vector<16xf32>
    %215 = vector.shape_cast %214 : vector<16xf32> to vector<16x1xf32>
    %216 = vector.broadcast %215 : vector<16x1xf32> to vector<16x16xf32>
    %217 = vector.broadcast %209 : vector<1x16xf32> to vector<16x16xf32>
    %218 = arith.mulf %216, %217 : vector<16x16xf32>
    %219 = arith.subf %180, %218 : vector<16x16xf32>
    %220 = vector.shape_cast %209 : vector<1x16xf32> to vector<1x16xf32>
    %221 = vector.broadcast %220 : vector<1x16xf32> to vector<16x16xf32>
    %222 = arith.select %189, %221, %219 : vector<16x16xi1>, vector<16x16xf32>
    %223 = vector.broadcast %215 : vector<16x1xf32> to vector<16x16xf32>
    %224 = vector.broadcast %211 : vector<1x16xf32> to vector<16x16xf32>
    %225 = arith.mulf %223, %224 : vector<16x16xf32>
    %226 = arith.subf %187, %225 : vector<16x16xf32>
    %227 = vector.shape_cast %211 : vector<1x16xf32> to vector<1x16xf32>
    %228 = vector.broadcast %227 : vector<1x16xf32> to vector<16x16xf32>
    %229 = arith.select %189, %228, %226 : vector<16x16xi1>, vector<16x16xf32>
    %c4_i32 = arith.constant 4 : i32
    %230 = vector.broadcast %c4_i32 : i32 to vector<16x16xi32>
    %231 = arith.cmpi eq, %53, %230 : vector<16x16xi32>
    %c4_i32_82 = arith.constant 4 : i32
    %232 = vector.broadcast %c4_i32_82 : i32 to vector<16x16xi32>
    %233 = arith.cmpi eq, %54, %232 : vector<16x16xi32>
    %cst_83 = arith.constant 0.000000e+00 : f32
    %234 = vector.broadcast %cst_83 : f32 to vector<16x16xf32>
    %235 = arith.select %231, %222, %234 : vector<16x16xi1>, vector<16x16xf32>
    %cst_84 = arith.constant dense<0.000000e+00> : vector<16xf32>
    %236 = vector.multi_reduction <add>, %235, %cst_84 [0] : vector<16x16xf32> to vector<16xf32>
    %237 = vector.shape_cast %236 : vector<16xf32> to vector<1x16xf32>
    %cst_85 = arith.constant 0.000000e+00 : f32
    %238 = vector.broadcast %cst_85 : f32 to vector<16x16xf32>
    %239 = arith.select %231, %229, %238 : vector<16x16xi1>, vector<16x16xf32>
    %cst_86 = arith.constant dense<0.000000e+00> : vector<16xf32>
    %240 = vector.multi_reduction <add>, %239, %cst_86 [0] : vector<16x16xf32> to vector<16xf32>
    %241 = vector.shape_cast %240 : vector<16xf32> to vector<1x16xf32>
    %c4_i32_87 = arith.constant 4 : i32
    %242 = vector.broadcast %c4_i32_87 : i32 to vector<1x16xi32>
    %243 = arith.cmpi eq, %55, %242 : vector<1x16xi32>
    %cst_88 = arith.constant 0.000000e+00 : f32
    %244 = vector.broadcast %cst_88 : f32 to vector<1x16xf32>
    %245 = arith.select %243, %237, %244 : vector<1x16xi1>, vector<1x16xf32>
    %cst_89 = arith.constant dense<0.000000e+00> : vector<1xf32>
    %246 = vector.multi_reduction <add>, %245, %cst_89 [1] : vector<1x16xf32> to vector<1xf32>
    %247 = vector.shape_cast %246 : vector<1xf32> to vector<1x1xf32>
    %cst_90 = arith.constant 1.000000e+00 : f32
    %248 = vector.broadcast %cst_90 : f32 to vector<1x1xf32>
    %249 = arith.divf %248, %247 : vector<1x1xf32>
    %250 = vector.broadcast %249 : vector<1x1xf32> to vector<1x16xf32>
    %251 = arith.mulf %237, %250 : vector<1x16xf32>
    %252 = vector.broadcast %249 : vector<1x1xf32> to vector<1x16xf32>
    %253 = arith.mulf %241, %252 : vector<1x16xf32>
    %cst_91 = arith.constant 0.000000e+00 : f32
    %254 = vector.broadcast %cst_91 : f32 to vector<16x16xf32>
    %255 = arith.select %233, %222, %254 : vector<16x16xi1>, vector<16x16xf32>
    %cst_92 = arith.constant dense<0.000000e+00> : vector<16xf32>
    %256 = vector.multi_reduction <add>, %255, %cst_92 [1] : vector<16x16xf32> to vector<16xf32>
    %257 = vector.shape_cast %256 : vector<16xf32> to vector<16x1xf32>
    %258 = vector.broadcast %257 : vector<16x1xf32> to vector<16x16xf32>
    %259 = vector.broadcast %251 : vector<1x16xf32> to vector<16x16xf32>
    %260 = arith.mulf %258, %259 : vector<16x16xf32>
    %261 = arith.subf %222, %260 : vector<16x16xf32>
    %262 = vector.shape_cast %251 : vector<1x16xf32> to vector<1x16xf32>
    %263 = vector.broadcast %262 : vector<1x16xf32> to vector<16x16xf32>
    %264 = arith.select %231, %263, %261 : vector<16x16xi1>, vector<16x16xf32>
    %265 = vector.broadcast %257 : vector<16x1xf32> to vector<16x16xf32>
    %266 = vector.broadcast %253 : vector<1x16xf32> to vector<16x16xf32>
    %267 = arith.mulf %265, %266 : vector<16x16xf32>
    %268 = arith.subf %229, %267 : vector<16x16xf32>
    %269 = vector.shape_cast %253 : vector<1x16xf32> to vector<1x16xf32>
    %270 = vector.broadcast %269 : vector<1x16xf32> to vector<16x16xf32>
    %271 = arith.select %231, %270, %268 : vector<16x16xi1>, vector<16x16xf32>
    %c5_i32 = arith.constant 5 : i32
    %272 = vector.broadcast %c5_i32 : i32 to vector<16x16xi32>
    %273 = arith.cmpi eq, %53, %272 : vector<16x16xi32>
    %c5_i32_93 = arith.constant 5 : i32
    %274 = vector.broadcast %c5_i32_93 : i32 to vector<16x16xi32>
    %275 = arith.cmpi eq, %54, %274 : vector<16x16xi32>
    %cst_94 = arith.constant 0.000000e+00 : f32
    %276 = vector.broadcast %cst_94 : f32 to vector<16x16xf32>
    %277 = arith.select %273, %264, %276 : vector<16x16xi1>, vector<16x16xf32>
    %cst_95 = arith.constant dense<0.000000e+00> : vector<16xf32>
    %278 = vector.multi_reduction <add>, %277, %cst_95 [0] : vector<16x16xf32> to vector<16xf32>
    %279 = vector.shape_cast %278 : vector<16xf32> to vector<1x16xf32>
    %cst_96 = arith.constant 0.000000e+00 : f32
    %280 = vector.broadcast %cst_96 : f32 to vector<16x16xf32>
    %281 = arith.select %273, %271, %280 : vector<16x16xi1>, vector<16x16xf32>
    %cst_97 = arith.constant dense<0.000000e+00> : vector<16xf32>
    %282 = vector.multi_reduction <add>, %281, %cst_97 [0] : vector<16x16xf32> to vector<16xf32>
    %283 = vector.shape_cast %282 : vector<16xf32> to vector<1x16xf32>
    %c5_i32_98 = arith.constant 5 : i32
    %284 = vector.broadcast %c5_i32_98 : i32 to vector<1x16xi32>
    %285 = arith.cmpi eq, %55, %284 : vector<1x16xi32>
    %cst_99 = arith.constant 0.000000e+00 : f32
    %286 = vector.broadcast %cst_99 : f32 to vector<1x16xf32>
    %287 = arith.select %285, %279, %286 : vector<1x16xi1>, vector<1x16xf32>
    %cst_100 = arith.constant dense<0.000000e+00> : vector<1xf32>
    %288 = vector.multi_reduction <add>, %287, %cst_100 [1] : vector<1x16xf32> to vector<1xf32>
    %289 = vector.shape_cast %288 : vector<1xf32> to vector<1x1xf32>
    %cst_101 = arith.constant 1.000000e+00 : f32
    %290 = vector.broadcast %cst_101 : f32 to vector<1x1xf32>
    %291 = arith.divf %290, %289 : vector<1x1xf32>
    %292 = vector.broadcast %291 : vector<1x1xf32> to vector<1x16xf32>
    %293 = arith.mulf %279, %292 : vector<1x16xf32>
    %294 = vector.broadcast %291 : vector<1x1xf32> to vector<1x16xf32>
    %295 = arith.mulf %283, %294 : vector<1x16xf32>
    %cst_102 = arith.constant 0.000000e+00 : f32
    %296 = vector.broadcast %cst_102 : f32 to vector<16x16xf32>
    %297 = arith.select %275, %264, %296 : vector<16x16xi1>, vector<16x16xf32>
    %cst_103 = arith.constant dense<0.000000e+00> : vector<16xf32>
    %298 = vector.multi_reduction <add>, %297, %cst_103 [1] : vector<16x16xf32> to vector<16xf32>
    %299 = vector.shape_cast %298 : vector<16xf32> to vector<16x1xf32>
    %300 = vector.broadcast %299 : vector<16x1xf32> to vector<16x16xf32>
    %301 = vector.broadcast %293 : vector<1x16xf32> to vector<16x16xf32>
    %302 = arith.mulf %300, %301 : vector<16x16xf32>
    %303 = arith.subf %264, %302 : vector<16x16xf32>
    %304 = vector.shape_cast %293 : vector<1x16xf32> to vector<1x16xf32>
    %305 = vector.broadcast %304 : vector<1x16xf32> to vector<16x16xf32>
    %306 = arith.select %273, %305, %303 : vector<16x16xi1>, vector<16x16xf32>
    %307 = vector.broadcast %299 : vector<16x1xf32> to vector<16x16xf32>
    %308 = vector.broadcast %295 : vector<1x16xf32> to vector<16x16xf32>
    %309 = arith.mulf %307, %308 : vector<16x16xf32>
    %310 = arith.subf %271, %309 : vector<16x16xf32>
    %311 = vector.shape_cast %295 : vector<1x16xf32> to vector<1x16xf32>
    %312 = vector.broadcast %311 : vector<1x16xf32> to vector<16x16xf32>
    %313 = arith.select %273, %312, %310 : vector<16x16xi1>, vector<16x16xf32>
    %c6_i32 = arith.constant 6 : i32
    %314 = vector.broadcast %c6_i32 : i32 to vector<16x16xi32>
    %315 = arith.cmpi eq, %53, %314 : vector<16x16xi32>
    %c6_i32_104 = arith.constant 6 : i32
    %316 = vector.broadcast %c6_i32_104 : i32 to vector<16x16xi32>
    %317 = arith.cmpi eq, %54, %316 : vector<16x16xi32>
    %cst_105 = arith.constant 0.000000e+00 : f32
    %318 = vector.broadcast %cst_105 : f32 to vector<16x16xf32>
    %319 = arith.select %315, %306, %318 : vector<16x16xi1>, vector<16x16xf32>
    %cst_106 = arith.constant dense<0.000000e+00> : vector<16xf32>
    %320 = vector.multi_reduction <add>, %319, %cst_106 [0] : vector<16x16xf32> to vector<16xf32>
    %321 = vector.shape_cast %320 : vector<16xf32> to vector<1x16xf32>
    %cst_107 = arith.constant 0.000000e+00 : f32
    %322 = vector.broadcast %cst_107 : f32 to vector<16x16xf32>
    %323 = arith.select %315, %313, %322 : vector<16x16xi1>, vector<16x16xf32>
    %cst_108 = arith.constant dense<0.000000e+00> : vector<16xf32>
    %324 = vector.multi_reduction <add>, %323, %cst_108 [0] : vector<16x16xf32> to vector<16xf32>
    %325 = vector.shape_cast %324 : vector<16xf32> to vector<1x16xf32>
    %c6_i32_109 = arith.constant 6 : i32
    %326 = vector.broadcast %c6_i32_109 : i32 to vector<1x16xi32>
    %327 = arith.cmpi eq, %55, %326 : vector<1x16xi32>
    %cst_110 = arith.constant 0.000000e+00 : f32
    %328 = vector.broadcast %cst_110 : f32 to vector<1x16xf32>
    %329 = arith.select %327, %321, %328 : vector<1x16xi1>, vector<1x16xf32>
    %cst_111 = arith.constant dense<0.000000e+00> : vector<1xf32>
    %330 = vector.multi_reduction <add>, %329, %cst_111 [1] : vector<1x16xf32> to vector<1xf32>
    %331 = vector.shape_cast %330 : vector<1xf32> to vector<1x1xf32>
    %cst_112 = arith.constant 1.000000e+00 : f32
    %332 = vector.broadcast %cst_112 : f32 to vector<1x1xf32>
    %333 = arith.divf %332, %331 : vector<1x1xf32>
    %334 = vector.broadcast %333 : vector<1x1xf32> to vector<1x16xf32>
    %335 = arith.mulf %321, %334 : vector<1x16xf32>
    %336 = vector.broadcast %333 : vector<1x1xf32> to vector<1x16xf32>
    %337 = arith.mulf %325, %336 : vector<1x16xf32>
    %cst_113 = arith.constant 0.000000e+00 : f32
    %338 = vector.broadcast %cst_113 : f32 to vector<16x16xf32>
    %339 = arith.select %317, %306, %338 : vector<16x16xi1>, vector<16x16xf32>
    %cst_114 = arith.constant dense<0.000000e+00> : vector<16xf32>
    %340 = vector.multi_reduction <add>, %339, %cst_114 [1] : vector<16x16xf32> to vector<16xf32>
    %341 = vector.shape_cast %340 : vector<16xf32> to vector<16x1xf32>
    %342 = vector.broadcast %341 : vector<16x1xf32> to vector<16x16xf32>
    %343 = vector.broadcast %335 : vector<1x16xf32> to vector<16x16xf32>
    %344 = arith.mulf %342, %343 : vector<16x16xf32>
    %345 = arith.subf %306, %344 : vector<16x16xf32>
    %346 = vector.shape_cast %335 : vector<1x16xf32> to vector<1x16xf32>
    %347 = vector.broadcast %346 : vector<1x16xf32> to vector<16x16xf32>
    %348 = arith.select %315, %347, %345 : vector<16x16xi1>, vector<16x16xf32>
    %349 = vector.broadcast %341 : vector<16x1xf32> to vector<16x16xf32>
    %350 = vector.broadcast %337 : vector<1x16xf32> to vector<16x16xf32>
    %351 = arith.mulf %349, %350 : vector<16x16xf32>
    %352 = arith.subf %313, %351 : vector<16x16xf32>
    %353 = vector.shape_cast %337 : vector<1x16xf32> to vector<1x16xf32>
    %354 = vector.broadcast %353 : vector<1x16xf32> to vector<16x16xf32>
    %355 = arith.select %315, %354, %352 : vector<16x16xi1>, vector<16x16xf32>
    %c7_i32 = arith.constant 7 : i32
    %356 = vector.broadcast %c7_i32 : i32 to vector<16x16xi32>
    %357 = arith.cmpi eq, %53, %356 : vector<16x16xi32>
    %c7_i32_115 = arith.constant 7 : i32
    %358 = vector.broadcast %c7_i32_115 : i32 to vector<16x16xi32>
    %359 = arith.cmpi eq, %54, %358 : vector<16x16xi32>
    %cst_116 = arith.constant 0.000000e+00 : f32
    %360 = vector.broadcast %cst_116 : f32 to vector<16x16xf32>
    %361 = arith.select %357, %348, %360 : vector<16x16xi1>, vector<16x16xf32>
    %cst_117 = arith.constant dense<0.000000e+00> : vector<16xf32>
    %362 = vector.multi_reduction <add>, %361, %cst_117 [0] : vector<16x16xf32> to vector<16xf32>
    %363 = vector.shape_cast %362 : vector<16xf32> to vector<1x16xf32>
    %cst_118 = arith.constant 0.000000e+00 : f32
    %364 = vector.broadcast %cst_118 : f32 to vector<16x16xf32>
    %365 = arith.select %357, %355, %364 : vector<16x16xi1>, vector<16x16xf32>
    %cst_119 = arith.constant dense<0.000000e+00> : vector<16xf32>
    %366 = vector.multi_reduction <add>, %365, %cst_119 [0] : vector<16x16xf32> to vector<16xf32>
    %367 = vector.shape_cast %366 : vector<16xf32> to vector<1x16xf32>
    %c7_i32_120 = arith.constant 7 : i32
    %368 = vector.broadcast %c7_i32_120 : i32 to vector<1x16xi32>
    %369 = arith.cmpi eq, %55, %368 : vector<1x16xi32>
    %cst_121 = arith.constant 0.000000e+00 : f32
    %370 = vector.broadcast %cst_121 : f32 to vector<1x16xf32>
    %371 = arith.select %369, %363, %370 : vector<1x16xi1>, vector<1x16xf32>
    %cst_122 = arith.constant dense<0.000000e+00> : vector<1xf32>
    %372 = vector.multi_reduction <add>, %371, %cst_122 [1] : vector<1x16xf32> to vector<1xf32>
    %373 = vector.shape_cast %372 : vector<1xf32> to vector<1x1xf32>
    %cst_123 = arith.constant 1.000000e+00 : f32
    %374 = vector.broadcast %cst_123 : f32 to vector<1x1xf32>
    %375 = arith.divf %374, %373 : vector<1x1xf32>
    %376 = vector.broadcast %375 : vector<1x1xf32> to vector<1x16xf32>
    %377 = arith.mulf %363, %376 : vector<1x16xf32>
    %378 = vector.broadcast %375 : vector<1x1xf32> to vector<1x16xf32>
    %379 = arith.mulf %367, %378 : vector<1x16xf32>
    %cst_124 = arith.constant 0.000000e+00 : f32
    %380 = vector.broadcast %cst_124 : f32 to vector<16x16xf32>
    %381 = arith.select %359, %348, %380 : vector<16x16xi1>, vector<16x16xf32>
    %cst_125 = arith.constant dense<0.000000e+00> : vector<16xf32>
    %382 = vector.multi_reduction <add>, %381, %cst_125 [1] : vector<16x16xf32> to vector<16xf32>
    %383 = vector.shape_cast %382 : vector<16xf32> to vector<16x1xf32>
    %384 = vector.broadcast %383 : vector<16x1xf32> to vector<16x16xf32>
    %385 = vector.broadcast %377 : vector<1x16xf32> to vector<16x16xf32>
    %386 = arith.mulf %384, %385 : vector<16x16xf32>
    %387 = arith.subf %348, %386 : vector<16x16xf32>
    %388 = vector.shape_cast %377 : vector<1x16xf32> to vector<1x16xf32>
    %389 = vector.broadcast %388 : vector<1x16xf32> to vector<16x16xf32>
    %390 = arith.select %357, %389, %387 : vector<16x16xi1>, vector<16x16xf32>
    %391 = vector.broadcast %383 : vector<16x1xf32> to vector<16x16xf32>
    %392 = vector.broadcast %379 : vector<1x16xf32> to vector<16x16xf32>
    %393 = arith.mulf %391, %392 : vector<16x16xf32>
    %394 = arith.subf %355, %393 : vector<16x16xf32>
    %395 = vector.shape_cast %379 : vector<1x16xf32> to vector<1x16xf32>
    %396 = vector.broadcast %395 : vector<1x16xf32> to vector<16x16xf32>
    %397 = arith.select %357, %396, %394 : vector<16x16xi1>, vector<16x16xf32>
    %c8_i32 = arith.constant 8 : i32
    %398 = vector.broadcast %c8_i32 : i32 to vector<16x16xi32>
    %399 = arith.cmpi eq, %53, %398 : vector<16x16xi32>
    %c8_i32_126 = arith.constant 8 : i32
    %400 = vector.broadcast %c8_i32_126 : i32 to vector<16x16xi32>
    %401 = arith.cmpi eq, %54, %400 : vector<16x16xi32>
    %cst_127 = arith.constant 0.000000e+00 : f32
    %402 = vector.broadcast %cst_127 : f32 to vector<16x16xf32>
    %403 = arith.select %399, %390, %402 : vector<16x16xi1>, vector<16x16xf32>
    %cst_128 = arith.constant dense<0.000000e+00> : vector<16xf32>
    %404 = vector.multi_reduction <add>, %403, %cst_128 [0] : vector<16x16xf32> to vector<16xf32>
    %405 = vector.shape_cast %404 : vector<16xf32> to vector<1x16xf32>
    %cst_129 = arith.constant 0.000000e+00 : f32
    %406 = vector.broadcast %cst_129 : f32 to vector<16x16xf32>
    %407 = arith.select %399, %397, %406 : vector<16x16xi1>, vector<16x16xf32>
    %cst_130 = arith.constant dense<0.000000e+00> : vector<16xf32>
    %408 = vector.multi_reduction <add>, %407, %cst_130 [0] : vector<16x16xf32> to vector<16xf32>
    %409 = vector.shape_cast %408 : vector<16xf32> to vector<1x16xf32>
    %c8_i32_131 = arith.constant 8 : i32
    %410 = vector.broadcast %c8_i32_131 : i32 to vector<1x16xi32>
    %411 = arith.cmpi eq, %55, %410 : vector<1x16xi32>
    %cst_132 = arith.constant 0.000000e+00 : f32
    %412 = vector.broadcast %cst_132 : f32 to vector<1x16xf32>
    %413 = arith.select %411, %405, %412 : vector<1x16xi1>, vector<1x16xf32>
    %cst_133 = arith.constant dense<0.000000e+00> : vector<1xf32>
    %414 = vector.multi_reduction <add>, %413, %cst_133 [1] : vector<1x16xf32> to vector<1xf32>
    %415 = vector.shape_cast %414 : vector<1xf32> to vector<1x1xf32>
    %cst_134 = arith.constant 1.000000e+00 : f32
    %416 = vector.broadcast %cst_134 : f32 to vector<1x1xf32>
    %417 = arith.divf %416, %415 : vector<1x1xf32>
    %418 = vector.broadcast %417 : vector<1x1xf32> to vector<1x16xf32>
    %419 = arith.mulf %405, %418 : vector<1x16xf32>
    %420 = vector.broadcast %417 : vector<1x1xf32> to vector<1x16xf32>
    %421 = arith.mulf %409, %420 : vector<1x16xf32>
    %cst_135 = arith.constant 0.000000e+00 : f32
    %422 = vector.broadcast %cst_135 : f32 to vector<16x16xf32>
    %423 = arith.select %401, %390, %422 : vector<16x16xi1>, vector<16x16xf32>
    %cst_136 = arith.constant dense<0.000000e+00> : vector<16xf32>
    %424 = vector.multi_reduction <add>, %423, %cst_136 [1] : vector<16x16xf32> to vector<16xf32>
    %425 = vector.shape_cast %424 : vector<16xf32> to vector<16x1xf32>
    %426 = vector.broadcast %425 : vector<16x1xf32> to vector<16x16xf32>
    %427 = vector.broadcast %419 : vector<1x16xf32> to vector<16x16xf32>
    %428 = arith.mulf %426, %427 : vector<16x16xf32>
    %429 = arith.subf %390, %428 : vector<16x16xf32>
    %430 = vector.shape_cast %419 : vector<1x16xf32> to vector<1x16xf32>
    %431 = vector.broadcast %430 : vector<1x16xf32> to vector<16x16xf32>
    %432 = arith.select %399, %431, %429 : vector<16x16xi1>, vector<16x16xf32>
    %433 = vector.broadcast %425 : vector<16x1xf32> to vector<16x16xf32>
    %434 = vector.broadcast %421 : vector<1x16xf32> to vector<16x16xf32>
    %435 = arith.mulf %433, %434 : vector<16x16xf32>
    %436 = arith.subf %397, %435 : vector<16x16xf32>
    %437 = vector.shape_cast %421 : vector<1x16xf32> to vector<1x16xf32>
    %438 = vector.broadcast %437 : vector<1x16xf32> to vector<16x16xf32>
    %439 = arith.select %399, %438, %436 : vector<16x16xi1>, vector<16x16xf32>
    %c9_i32 = arith.constant 9 : i32
    %440 = vector.broadcast %c9_i32 : i32 to vector<16x16xi32>
    %441 = arith.cmpi eq, %53, %440 : vector<16x16xi32>
    %c9_i32_137 = arith.constant 9 : i32
    %442 = vector.broadcast %c9_i32_137 : i32 to vector<16x16xi32>
    %443 = arith.cmpi eq, %54, %442 : vector<16x16xi32>
    %cst_138 = arith.constant 0.000000e+00 : f32
    %444 = vector.broadcast %cst_138 : f32 to vector<16x16xf32>
    %445 = arith.select %441, %432, %444 : vector<16x16xi1>, vector<16x16xf32>
    %cst_139 = arith.constant dense<0.000000e+00> : vector<16xf32>
    %446 = vector.multi_reduction <add>, %445, %cst_139 [0] : vector<16x16xf32> to vector<16xf32>
    %447 = vector.shape_cast %446 : vector<16xf32> to vector<1x16xf32>
    %cst_140 = arith.constant 0.000000e+00 : f32
    %448 = vector.broadcast %cst_140 : f32 to vector<16x16xf32>
    %449 = arith.select %441, %439, %448 : vector<16x16xi1>, vector<16x16xf32>
    %cst_141 = arith.constant dense<0.000000e+00> : vector<16xf32>
    %450 = vector.multi_reduction <add>, %449, %cst_141 [0] : vector<16x16xf32> to vector<16xf32>
    %451 = vector.shape_cast %450 : vector<16xf32> to vector<1x16xf32>
    %c9_i32_142 = arith.constant 9 : i32
    %452 = vector.broadcast %c9_i32_142 : i32 to vector<1x16xi32>
    %453 = arith.cmpi eq, %55, %452 : vector<1x16xi32>
    %cst_143 = arith.constant 0.000000e+00 : f32
    %454 = vector.broadcast %cst_143 : f32 to vector<1x16xf32>
    %455 = arith.select %453, %447, %454 : vector<1x16xi1>, vector<1x16xf32>
    %cst_144 = arith.constant dense<0.000000e+00> : vector<1xf32>
    %456 = vector.multi_reduction <add>, %455, %cst_144 [1] : vector<1x16xf32> to vector<1xf32>
    %457 = vector.shape_cast %456 : vector<1xf32> to vector<1x1xf32>
    %cst_145 = arith.constant 1.000000e+00 : f32
    %458 = vector.broadcast %cst_145 : f32 to vector<1x1xf32>
    %459 = arith.divf %458, %457 : vector<1x1xf32>
    %460 = vector.broadcast %459 : vector<1x1xf32> to vector<1x16xf32>
    %461 = arith.mulf %447, %460 : vector<1x16xf32>
    %462 = vector.broadcast %459 : vector<1x1xf32> to vector<1x16xf32>
    %463 = arith.mulf %451, %462 : vector<1x16xf32>
    %cst_146 = arith.constant 0.000000e+00 : f32
    %464 = vector.broadcast %cst_146 : f32 to vector<16x16xf32>
    %465 = arith.select %443, %432, %464 : vector<16x16xi1>, vector<16x16xf32>
    %cst_147 = arith.constant dense<0.000000e+00> : vector<16xf32>
    %466 = vector.multi_reduction <add>, %465, %cst_147 [1] : vector<16x16xf32> to vector<16xf32>
    %467 = vector.shape_cast %466 : vector<16xf32> to vector<16x1xf32>
    %468 = vector.broadcast %467 : vector<16x1xf32> to vector<16x16xf32>
    %469 = vector.broadcast %461 : vector<1x16xf32> to vector<16x16xf32>
    %470 = arith.mulf %468, %469 : vector<16x16xf32>
    %471 = arith.subf %432, %470 : vector<16x16xf32>
    %472 = vector.shape_cast %461 : vector<1x16xf32> to vector<1x16xf32>
    %473 = vector.broadcast %472 : vector<1x16xf32> to vector<16x16xf32>
    %474 = arith.select %441, %473, %471 : vector<16x16xi1>, vector<16x16xf32>
    %475 = vector.broadcast %467 : vector<16x1xf32> to vector<16x16xf32>
    %476 = vector.broadcast %463 : vector<1x16xf32> to vector<16x16xf32>
    %477 = arith.mulf %475, %476 : vector<16x16xf32>
    %478 = arith.subf %439, %477 : vector<16x16xf32>
    %479 = vector.shape_cast %463 : vector<1x16xf32> to vector<1x16xf32>
    %480 = vector.broadcast %479 : vector<1x16xf32> to vector<16x16xf32>
    %481 = arith.select %441, %480, %478 : vector<16x16xi1>, vector<16x16xf32>
    %c10_i32 = arith.constant 10 : i32
    %482 = vector.broadcast %c10_i32 : i32 to vector<16x16xi32>
    %483 = arith.cmpi eq, %53, %482 : vector<16x16xi32>
    %c10_i32_148 = arith.constant 10 : i32
    %484 = vector.broadcast %c10_i32_148 : i32 to vector<16x16xi32>
    %485 = arith.cmpi eq, %54, %484 : vector<16x16xi32>
    %cst_149 = arith.constant 0.000000e+00 : f32
    %486 = vector.broadcast %cst_149 : f32 to vector<16x16xf32>
    %487 = arith.select %483, %474, %486 : vector<16x16xi1>, vector<16x16xf32>
    %cst_150 = arith.constant dense<0.000000e+00> : vector<16xf32>
    %488 = vector.multi_reduction <add>, %487, %cst_150 [0] : vector<16x16xf32> to vector<16xf32>
    %489 = vector.shape_cast %488 : vector<16xf32> to vector<1x16xf32>
    %cst_151 = arith.constant 0.000000e+00 : f32
    %490 = vector.broadcast %cst_151 : f32 to vector<16x16xf32>
    %491 = arith.select %483, %481, %490 : vector<16x16xi1>, vector<16x16xf32>
    %cst_152 = arith.constant dense<0.000000e+00> : vector<16xf32>
    %492 = vector.multi_reduction <add>, %491, %cst_152 [0] : vector<16x16xf32> to vector<16xf32>
    %493 = vector.shape_cast %492 : vector<16xf32> to vector<1x16xf32>
    %c10_i32_153 = arith.constant 10 : i32
    %494 = vector.broadcast %c10_i32_153 : i32 to vector<1x16xi32>
    %495 = arith.cmpi eq, %55, %494 : vector<1x16xi32>
    %cst_154 = arith.constant 0.000000e+00 : f32
    %496 = vector.broadcast %cst_154 : f32 to vector<1x16xf32>
    %497 = arith.select %495, %489, %496 : vector<1x16xi1>, vector<1x16xf32>
    %cst_155 = arith.constant dense<0.000000e+00> : vector<1xf32>
    %498 = vector.multi_reduction <add>, %497, %cst_155 [1] : vector<1x16xf32> to vector<1xf32>
    %499 = vector.shape_cast %498 : vector<1xf32> to vector<1x1xf32>
    %cst_156 = arith.constant 1.000000e+00 : f32
    %500 = vector.broadcast %cst_156 : f32 to vector<1x1xf32>
    %501 = arith.divf %500, %499 : vector<1x1xf32>
    %502 = vector.broadcast %501 : vector<1x1xf32> to vector<1x16xf32>
    %503 = arith.mulf %489, %502 : vector<1x16xf32>
    %504 = vector.broadcast %501 : vector<1x1xf32> to vector<1x16xf32>
    %505 = arith.mulf %493, %504 : vector<1x16xf32>
    %cst_157 = arith.constant 0.000000e+00 : f32
    %506 = vector.broadcast %cst_157 : f32 to vector<16x16xf32>
    %507 = arith.select %485, %474, %506 : vector<16x16xi1>, vector<16x16xf32>
    %cst_158 = arith.constant dense<0.000000e+00> : vector<16xf32>
    %508 = vector.multi_reduction <add>, %507, %cst_158 [1] : vector<16x16xf32> to vector<16xf32>
    %509 = vector.shape_cast %508 : vector<16xf32> to vector<16x1xf32>
    %510 = vector.broadcast %509 : vector<16x1xf32> to vector<16x16xf32>
    %511 = vector.broadcast %503 : vector<1x16xf32> to vector<16x16xf32>
    %512 = arith.mulf %510, %511 : vector<16x16xf32>
    %513 = arith.subf %474, %512 : vector<16x16xf32>
    %514 = vector.shape_cast %503 : vector<1x16xf32> to vector<1x16xf32>
    %515 = vector.broadcast %514 : vector<1x16xf32> to vector<16x16xf32>
    %516 = arith.select %483, %515, %513 : vector<16x16xi1>, vector<16x16xf32>
    %517 = vector.broadcast %509 : vector<16x1xf32> to vector<16x16xf32>
    %518 = vector.broadcast %505 : vector<1x16xf32> to vector<16x16xf32>
    %519 = arith.mulf %517, %518 : vector<16x16xf32>
    %520 = arith.subf %481, %519 : vector<16x16xf32>
    %521 = vector.shape_cast %505 : vector<1x16xf32> to vector<1x16xf32>
    %522 = vector.broadcast %521 : vector<1x16xf32> to vector<16x16xf32>
    %523 = arith.select %483, %522, %520 : vector<16x16xi1>, vector<16x16xf32>
    %c11_i32 = arith.constant 11 : i32
    %524 = vector.broadcast %c11_i32 : i32 to vector<16x16xi32>
    %525 = arith.cmpi eq, %53, %524 : vector<16x16xi32>
    %c11_i32_159 = arith.constant 11 : i32
    %526 = vector.broadcast %c11_i32_159 : i32 to vector<16x16xi32>
    %527 = arith.cmpi eq, %54, %526 : vector<16x16xi32>
    %cst_160 = arith.constant 0.000000e+00 : f32
    %528 = vector.broadcast %cst_160 : f32 to vector<16x16xf32>
    %529 = arith.select %525, %516, %528 : vector<16x16xi1>, vector<16x16xf32>
    %cst_161 = arith.constant dense<0.000000e+00> : vector<16xf32>
    %530 = vector.multi_reduction <add>, %529, %cst_161 [0] : vector<16x16xf32> to vector<16xf32>
    %531 = vector.shape_cast %530 : vector<16xf32> to vector<1x16xf32>
    %cst_162 = arith.constant 0.000000e+00 : f32
    %532 = vector.broadcast %cst_162 : f32 to vector<16x16xf32>
    %533 = arith.select %525, %523, %532 : vector<16x16xi1>, vector<16x16xf32>
    %cst_163 = arith.constant dense<0.000000e+00> : vector<16xf32>
    %534 = vector.multi_reduction <add>, %533, %cst_163 [0] : vector<16x16xf32> to vector<16xf32>
    %535 = vector.shape_cast %534 : vector<16xf32> to vector<1x16xf32>
    %c11_i32_164 = arith.constant 11 : i32
    %536 = vector.broadcast %c11_i32_164 : i32 to vector<1x16xi32>
    %537 = arith.cmpi eq, %55, %536 : vector<1x16xi32>
    %cst_165 = arith.constant 0.000000e+00 : f32
    %538 = vector.broadcast %cst_165 : f32 to vector<1x16xf32>
    %539 = arith.select %537, %531, %538 : vector<1x16xi1>, vector<1x16xf32>
    %cst_166 = arith.constant dense<0.000000e+00> : vector<1xf32>
    %540 = vector.multi_reduction <add>, %539, %cst_166 [1] : vector<1x16xf32> to vector<1xf32>
    %541 = vector.shape_cast %540 : vector<1xf32> to vector<1x1xf32>
    %cst_167 = arith.constant 1.000000e+00 : f32
    %542 = vector.broadcast %cst_167 : f32 to vector<1x1xf32>
    %543 = arith.divf %542, %541 : vector<1x1xf32>
    %544 = vector.broadcast %543 : vector<1x1xf32> to vector<1x16xf32>
    %545 = arith.mulf %531, %544 : vector<1x16xf32>
    %546 = vector.broadcast %543 : vector<1x1xf32> to vector<1x16xf32>
    %547 = arith.mulf %535, %546 : vector<1x16xf32>
    %cst_168 = arith.constant 0.000000e+00 : f32
    %548 = vector.broadcast %cst_168 : f32 to vector<16x16xf32>
    %549 = arith.select %527, %516, %548 : vector<16x16xi1>, vector<16x16xf32>
    %cst_169 = arith.constant dense<0.000000e+00> : vector<16xf32>
    %550 = vector.multi_reduction <add>, %549, %cst_169 [1] : vector<16x16xf32> to vector<16xf32>
    %551 = vector.shape_cast %550 : vector<16xf32> to vector<16x1xf32>
    %552 = vector.broadcast %551 : vector<16x1xf32> to vector<16x16xf32>
    %553 = vector.broadcast %545 : vector<1x16xf32> to vector<16x16xf32>
    %554 = arith.mulf %552, %553 : vector<16x16xf32>
    %555 = arith.subf %516, %554 : vector<16x16xf32>
    %556 = vector.shape_cast %545 : vector<1x16xf32> to vector<1x16xf32>
    %557 = vector.broadcast %556 : vector<1x16xf32> to vector<16x16xf32>
    %558 = arith.select %525, %557, %555 : vector<16x16xi1>, vector<16x16xf32>
    %559 = vector.broadcast %551 : vector<16x1xf32> to vector<16x16xf32>
    %560 = vector.broadcast %547 : vector<1x16xf32> to vector<16x16xf32>
    %561 = arith.mulf %559, %560 : vector<16x16xf32>
    %562 = arith.subf %523, %561 : vector<16x16xf32>
    %563 = vector.shape_cast %547 : vector<1x16xf32> to vector<1x16xf32>
    %564 = vector.broadcast %563 : vector<1x16xf32> to vector<16x16xf32>
    %565 = arith.select %525, %564, %562 : vector<16x16xi1>, vector<16x16xf32>
    %c12_i32 = arith.constant 12 : i32
    %566 = vector.broadcast %c12_i32 : i32 to vector<16x16xi32>
    %567 = arith.cmpi eq, %53, %566 : vector<16x16xi32>
    %c12_i32_170 = arith.constant 12 : i32
    %568 = vector.broadcast %c12_i32_170 : i32 to vector<16x16xi32>
    %569 = arith.cmpi eq, %54, %568 : vector<16x16xi32>
    %cst_171 = arith.constant 0.000000e+00 : f32
    %570 = vector.broadcast %cst_171 : f32 to vector<16x16xf32>
    %571 = arith.select %567, %558, %570 : vector<16x16xi1>, vector<16x16xf32>
    %cst_172 = arith.constant dense<0.000000e+00> : vector<16xf32>
    %572 = vector.multi_reduction <add>, %571, %cst_172 [0] : vector<16x16xf32> to vector<16xf32>
    %573 = vector.shape_cast %572 : vector<16xf32> to vector<1x16xf32>
    %cst_173 = arith.constant 0.000000e+00 : f32
    %574 = vector.broadcast %cst_173 : f32 to vector<16x16xf32>
    %575 = arith.select %567, %565, %574 : vector<16x16xi1>, vector<16x16xf32>
    %cst_174 = arith.constant dense<0.000000e+00> : vector<16xf32>
    %576 = vector.multi_reduction <add>, %575, %cst_174 [0] : vector<16x16xf32> to vector<16xf32>
    %577 = vector.shape_cast %576 : vector<16xf32> to vector<1x16xf32>
    %c12_i32_175 = arith.constant 12 : i32
    %578 = vector.broadcast %c12_i32_175 : i32 to vector<1x16xi32>
    %579 = arith.cmpi eq, %55, %578 : vector<1x16xi32>
    %cst_176 = arith.constant 0.000000e+00 : f32
    %580 = vector.broadcast %cst_176 : f32 to vector<1x16xf32>
    %581 = arith.select %579, %573, %580 : vector<1x16xi1>, vector<1x16xf32>
    %cst_177 = arith.constant dense<0.000000e+00> : vector<1xf32>
    %582 = vector.multi_reduction <add>, %581, %cst_177 [1] : vector<1x16xf32> to vector<1xf32>
    %583 = vector.shape_cast %582 : vector<1xf32> to vector<1x1xf32>
    %cst_178 = arith.constant 1.000000e+00 : f32
    %584 = vector.broadcast %cst_178 : f32 to vector<1x1xf32>
    %585 = arith.divf %584, %583 : vector<1x1xf32>
    %586 = vector.broadcast %585 : vector<1x1xf32> to vector<1x16xf32>
    %587 = arith.mulf %573, %586 : vector<1x16xf32>
    %588 = vector.broadcast %585 : vector<1x1xf32> to vector<1x16xf32>
    %589 = arith.mulf %577, %588 : vector<1x16xf32>
    %cst_179 = arith.constant 0.000000e+00 : f32
    %590 = vector.broadcast %cst_179 : f32 to vector<16x16xf32>
    %591 = arith.select %569, %558, %590 : vector<16x16xi1>, vector<16x16xf32>
    %cst_180 = arith.constant dense<0.000000e+00> : vector<16xf32>
    %592 = vector.multi_reduction <add>, %591, %cst_180 [1] : vector<16x16xf32> to vector<16xf32>
    %593 = vector.shape_cast %592 : vector<16xf32> to vector<16x1xf32>
    %594 = vector.broadcast %593 : vector<16x1xf32> to vector<16x16xf32>
    %595 = vector.broadcast %587 : vector<1x16xf32> to vector<16x16xf32>
    %596 = arith.mulf %594, %595 : vector<16x16xf32>
    %597 = arith.subf %558, %596 : vector<16x16xf32>
    %598 = vector.shape_cast %587 : vector<1x16xf32> to vector<1x16xf32>
    %599 = vector.broadcast %598 : vector<1x16xf32> to vector<16x16xf32>
    %600 = arith.select %567, %599, %597 : vector<16x16xi1>, vector<16x16xf32>
    %601 = vector.broadcast %593 : vector<16x1xf32> to vector<16x16xf32>
    %602 = vector.broadcast %589 : vector<1x16xf32> to vector<16x16xf32>
    %603 = arith.mulf %601, %602 : vector<16x16xf32>
    %604 = arith.subf %565, %603 : vector<16x16xf32>
    %605 = vector.shape_cast %589 : vector<1x16xf32> to vector<1x16xf32>
    %606 = vector.broadcast %605 : vector<1x16xf32> to vector<16x16xf32>
    %607 = arith.select %567, %606, %604 : vector<16x16xi1>, vector<16x16xf32>
    %c13_i32 = arith.constant 13 : i32
    %608 = vector.broadcast %c13_i32 : i32 to vector<16x16xi32>
    %609 = arith.cmpi eq, %53, %608 : vector<16x16xi32>
    %c13_i32_181 = arith.constant 13 : i32
    %610 = vector.broadcast %c13_i32_181 : i32 to vector<16x16xi32>
    %611 = arith.cmpi eq, %54, %610 : vector<16x16xi32>
    %cst_182 = arith.constant 0.000000e+00 : f32
    %612 = vector.broadcast %cst_182 : f32 to vector<16x16xf32>
    %613 = arith.select %609, %600, %612 : vector<16x16xi1>, vector<16x16xf32>
    %cst_183 = arith.constant dense<0.000000e+00> : vector<16xf32>
    %614 = vector.multi_reduction <add>, %613, %cst_183 [0] : vector<16x16xf32> to vector<16xf32>
    %615 = vector.shape_cast %614 : vector<16xf32> to vector<1x16xf32>
    %cst_184 = arith.constant 0.000000e+00 : f32
    %616 = vector.broadcast %cst_184 : f32 to vector<16x16xf32>
    %617 = arith.select %609, %607, %616 : vector<16x16xi1>, vector<16x16xf32>
    %cst_185 = arith.constant dense<0.000000e+00> : vector<16xf32>
    %618 = vector.multi_reduction <add>, %617, %cst_185 [0] : vector<16x16xf32> to vector<16xf32>
    %619 = vector.shape_cast %618 : vector<16xf32> to vector<1x16xf32>
    %c13_i32_186 = arith.constant 13 : i32
    %620 = vector.broadcast %c13_i32_186 : i32 to vector<1x16xi32>
    %621 = arith.cmpi eq, %55, %620 : vector<1x16xi32>
    %cst_187 = arith.constant 0.000000e+00 : f32
    %622 = vector.broadcast %cst_187 : f32 to vector<1x16xf32>
    %623 = arith.select %621, %615, %622 : vector<1x16xi1>, vector<1x16xf32>
    %cst_188 = arith.constant dense<0.000000e+00> : vector<1xf32>
    %624 = vector.multi_reduction <add>, %623, %cst_188 [1] : vector<1x16xf32> to vector<1xf32>
    %625 = vector.shape_cast %624 : vector<1xf32> to vector<1x1xf32>
    %cst_189 = arith.constant 1.000000e+00 : f32
    %626 = vector.broadcast %cst_189 : f32 to vector<1x1xf32>
    %627 = arith.divf %626, %625 : vector<1x1xf32>
    %628 = vector.broadcast %627 : vector<1x1xf32> to vector<1x16xf32>
    %629 = arith.mulf %615, %628 : vector<1x16xf32>
    %630 = vector.broadcast %627 : vector<1x1xf32> to vector<1x16xf32>
    %631 = arith.mulf %619, %630 : vector<1x16xf32>
    %cst_190 = arith.constant 0.000000e+00 : f32
    %632 = vector.broadcast %cst_190 : f32 to vector<16x16xf32>
    %633 = arith.select %611, %600, %632 : vector<16x16xi1>, vector<16x16xf32>
    %cst_191 = arith.constant dense<0.000000e+00> : vector<16xf32>
    %634 = vector.multi_reduction <add>, %633, %cst_191 [1] : vector<16x16xf32> to vector<16xf32>
    %635 = vector.shape_cast %634 : vector<16xf32> to vector<16x1xf32>
    %636 = vector.broadcast %635 : vector<16x1xf32> to vector<16x16xf32>
    %637 = vector.broadcast %629 : vector<1x16xf32> to vector<16x16xf32>
    %638 = arith.mulf %636, %637 : vector<16x16xf32>
    %639 = arith.subf %600, %638 : vector<16x16xf32>
    %640 = vector.shape_cast %629 : vector<1x16xf32> to vector<1x16xf32>
    %641 = vector.broadcast %640 : vector<1x16xf32> to vector<16x16xf32>
    %642 = arith.select %609, %641, %639 : vector<16x16xi1>, vector<16x16xf32>
    %643 = vector.broadcast %635 : vector<16x1xf32> to vector<16x16xf32>
    %644 = vector.broadcast %631 : vector<1x16xf32> to vector<16x16xf32>
    %645 = arith.mulf %643, %644 : vector<16x16xf32>
    %646 = arith.subf %607, %645 : vector<16x16xf32>
    %647 = vector.shape_cast %631 : vector<1x16xf32> to vector<1x16xf32>
    %648 = vector.broadcast %647 : vector<1x16xf32> to vector<16x16xf32>
    %649 = arith.select %609, %648, %646 : vector<16x16xi1>, vector<16x16xf32>
    %c14_i32 = arith.constant 14 : i32
    %650 = vector.broadcast %c14_i32 : i32 to vector<16x16xi32>
    %651 = arith.cmpi eq, %53, %650 : vector<16x16xi32>
    %c14_i32_192 = arith.constant 14 : i32
    %652 = vector.broadcast %c14_i32_192 : i32 to vector<16x16xi32>
    %653 = arith.cmpi eq, %54, %652 : vector<16x16xi32>
    %cst_193 = arith.constant 0.000000e+00 : f32
    %654 = vector.broadcast %cst_193 : f32 to vector<16x16xf32>
    %655 = arith.select %651, %642, %654 : vector<16x16xi1>, vector<16x16xf32>
    %cst_194 = arith.constant dense<0.000000e+00> : vector<16xf32>
    %656 = vector.multi_reduction <add>, %655, %cst_194 [0] : vector<16x16xf32> to vector<16xf32>
    %657 = vector.shape_cast %656 : vector<16xf32> to vector<1x16xf32>
    %cst_195 = arith.constant 0.000000e+00 : f32
    %658 = vector.broadcast %cst_195 : f32 to vector<16x16xf32>
    %659 = arith.select %651, %649, %658 : vector<16x16xi1>, vector<16x16xf32>
    %cst_196 = arith.constant dense<0.000000e+00> : vector<16xf32>
    %660 = vector.multi_reduction <add>, %659, %cst_196 [0] : vector<16x16xf32> to vector<16xf32>
    %661 = vector.shape_cast %660 : vector<16xf32> to vector<1x16xf32>
    %c14_i32_197 = arith.constant 14 : i32
    %662 = vector.broadcast %c14_i32_197 : i32 to vector<1x16xi32>
    %663 = arith.cmpi eq, %55, %662 : vector<1x16xi32>
    %cst_198 = arith.constant 0.000000e+00 : f32
    %664 = vector.broadcast %cst_198 : f32 to vector<1x16xf32>
    %665 = arith.select %663, %657, %664 : vector<1x16xi1>, vector<1x16xf32>
    %cst_199 = arith.constant dense<0.000000e+00> : vector<1xf32>
    %666 = vector.multi_reduction <add>, %665, %cst_199 [1] : vector<1x16xf32> to vector<1xf32>
    %667 = vector.shape_cast %666 : vector<1xf32> to vector<1x1xf32>
    %cst_200 = arith.constant 1.000000e+00 : f32
    %668 = vector.broadcast %cst_200 : f32 to vector<1x1xf32>
    %669 = arith.divf %668, %667 : vector<1x1xf32>
    %670 = vector.broadcast %669 : vector<1x1xf32> to vector<1x16xf32>
    %671 = arith.mulf %657, %670 : vector<1x16xf32>
    %672 = vector.broadcast %669 : vector<1x1xf32> to vector<1x16xf32>
    %673 = arith.mulf %661, %672 : vector<1x16xf32>
    %cst_201 = arith.constant 0.000000e+00 : f32
    %674 = vector.broadcast %cst_201 : f32 to vector<16x16xf32>
    %675 = arith.select %653, %642, %674 : vector<16x16xi1>, vector<16x16xf32>
    %cst_202 = arith.constant dense<0.000000e+00> : vector<16xf32>
    %676 = vector.multi_reduction <add>, %675, %cst_202 [1] : vector<16x16xf32> to vector<16xf32>
    %677 = vector.shape_cast %676 : vector<16xf32> to vector<16x1xf32>
    %678 = vector.broadcast %677 : vector<16x1xf32> to vector<16x16xf32>
    %679 = vector.broadcast %671 : vector<1x16xf32> to vector<16x16xf32>
    %680 = arith.mulf %678, %679 : vector<16x16xf32>
    %681 = arith.subf %642, %680 : vector<16x16xf32>
    %682 = vector.shape_cast %671 : vector<1x16xf32> to vector<1x16xf32>
    %683 = vector.broadcast %682 : vector<1x16xf32> to vector<16x16xf32>
    %684 = arith.select %651, %683, %681 : vector<16x16xi1>, vector<16x16xf32>
    %685 = vector.broadcast %677 : vector<16x1xf32> to vector<16x16xf32>
    %686 = vector.broadcast %673 : vector<1x16xf32> to vector<16x16xf32>
    %687 = arith.mulf %685, %686 : vector<16x16xf32>
    %688 = arith.subf %649, %687 : vector<16x16xf32>
    %689 = vector.shape_cast %673 : vector<1x16xf32> to vector<1x16xf32>
    %690 = vector.broadcast %689 : vector<1x16xf32> to vector<16x16xf32>
    %691 = arith.select %651, %690, %688 : vector<16x16xi1>, vector<16x16xf32>
    %c15_i32 = arith.constant 15 : i32
    %692 = vector.broadcast %c15_i32 : i32 to vector<16x16xi32>
    %693 = arith.cmpi eq, %53, %692 : vector<16x16xi32>
    %c15_i32_203 = arith.constant 15 : i32
    %694 = vector.broadcast %c15_i32_203 : i32 to vector<16x16xi32>
    %695 = arith.cmpi eq, %54, %694 : vector<16x16xi32>
    %cst_204 = arith.constant 0.000000e+00 : f32
    %696 = vector.broadcast %cst_204 : f32 to vector<16x16xf32>
    %697 = arith.select %693, %684, %696 : vector<16x16xi1>, vector<16x16xf32>
    %cst_205 = arith.constant dense<0.000000e+00> : vector<16xf32>
    %698 = vector.multi_reduction <add>, %697, %cst_205 [0] : vector<16x16xf32> to vector<16xf32>
    %699 = vector.shape_cast %698 : vector<16xf32> to vector<1x16xf32>
    %cst_206 = arith.constant 0.000000e+00 : f32
    %700 = vector.broadcast %cst_206 : f32 to vector<16x16xf32>
    %701 = arith.select %693, %691, %700 : vector<16x16xi1>, vector<16x16xf32>
    %cst_207 = arith.constant dense<0.000000e+00> : vector<16xf32>
    %702 = vector.multi_reduction <add>, %701, %cst_207 [0] : vector<16x16xf32> to vector<16xf32>
    %703 = vector.shape_cast %702 : vector<16xf32> to vector<1x16xf32>
    %c15_i32_208 = arith.constant 15 : i32
    %704 = vector.broadcast %c15_i32_208 : i32 to vector<1x16xi32>
    %705 = arith.cmpi eq, %55, %704 : vector<1x16xi32>
    %cst_209 = arith.constant 0.000000e+00 : f32
    %706 = vector.broadcast %cst_209 : f32 to vector<1x16xf32>
    %707 = arith.select %705, %699, %706 : vector<1x16xi1>, vector<1x16xf32>
    %cst_210 = arith.constant dense<0.000000e+00> : vector<1xf32>
    %708 = vector.multi_reduction <add>, %707, %cst_210 [1] : vector<1x16xf32> to vector<1xf32>
    %709 = vector.shape_cast %708 : vector<1xf32> to vector<1x1xf32>
    %cst_211 = arith.constant 1.000000e+00 : f32
    %710 = vector.broadcast %cst_211 : f32 to vector<1x1xf32>
    %711 = arith.divf %710, %709 : vector<1x1xf32>
    %712 = vector.broadcast %711 : vector<1x1xf32> to vector<1x16xf32>
    %713 = arith.mulf %703, %712 : vector<1x16xf32>
    %cst_212 = arith.constant 0.000000e+00 : f32
    %714 = vector.broadcast %cst_212 : f32 to vector<16x16xf32>
    %715 = arith.select %695, %684, %714 : vector<16x16xi1>, vector<16x16xf32>
    %cst_213 = arith.constant dense<0.000000e+00> : vector<16xf32>
    %716 = vector.multi_reduction <add>, %715, %cst_213 [1] : vector<16x16xf32> to vector<16xf32>
    %717 = vector.shape_cast %716 : vector<16xf32> to vector<16x1xf32>
    %718 = vector.broadcast %717 : vector<16x1xf32> to vector<16x16xf32>
    %719 = vector.broadcast %713 : vector<1x16xf32> to vector<16x16xf32>
    %720 = arith.mulf %718, %719 : vector<16x16xf32>
    %721 = arith.subf %691, %720 : vector<16x16xf32>
    %722 = vector.shape_cast %713 : vector<1x16xf32> to vector<1x16xf32>
    %723 = vector.broadcast %722 : vector<1x16xf32> to vector<16x16xf32>
    %724 = arith.select %693, %723, %721 : vector<16x16xi1>, vector<16x16xf32>
    %cst_214 = arith.constant dense<0.000000e+00> : vector<16x16xf32>
    %725 = tpu.matmul %724, %52, %cst_214 {dimension_numbers = #tpu.dot_dimension_numbers<[1], [0], [0], [1], [0, 0, 1, 1], [], []>} : vector<16x16xf32>, vector<16x16xf32>, vector<16x16xf32> -> vector<16x16xf32>
    %cst_215 = arith.constant 5.000000e-01 : f32
    %726 = vector.broadcast %cst_215 : f32 to vector<8x16xf32>
    %727 = arith.mulf %726, %25 : vector<8x16xf32>
    %cst_216 = arith.constant dense<0.000000e+00> : vector<8x16xf32>
    %728 = tpu.matmul %25, %725, %cst_216 {dimension_numbers = #tpu.dot_dimension_numbers<[1], [0], [0], [1], [0, 0, 1, 1], [], []>} : vector<8x16xf32>, vector<16x16xf32>, vector<8x16xf32> -> vector<8x16xf32>
    %cst_217 = arith.constant 2.500000e-01 : f32
    %729 = vector.broadcast %cst_217 : f32 to vector<8x16xf32>
    %730 = arith.mulf %729, %728 : vector<8x16xf32>
    %731 = arith.subf %727, %730 : vector<8x16xf32>
    %cst_218 = arith.constant dense<0.000000e+00> : vector<16x16xf32>
    %732 = tpu.matmul %25, %731, %cst_218 {dimension_numbers = #tpu.dot_dimension_numbers<[0], [0], [1], [1], [0, 1, 1, 1], [], []>} : vector<8x16xf32>, vector<8x16xf32>, vector<16x16xf32> -> vector<16x16xf32>
    %c0_219 = arith.constant 0 : index
    %c0_220 = arith.constant 0 : index
    %733 = vector.load %arg5[%c0_219, %c0_220] : memref<8x8xbf16, #tpu.memory_space<vmem>>, vector<8x8xbf16>
    %734 = arith.extf %733 : vector<8x8xbf16> to vector<8x8xf32>
    %cst_221 = arith.constant dense<0.000000e+00> : vector<8x16xf32>
    %735 = tpu.matmul %25, %732, %cst_221 {dimension_numbers = #tpu.dot_dimension_numbers<[1], [0], [0], [1], [0, 0, 1, 1], [], []>} : vector<8x16xf32>, vector<16x16xf32>, vector<8x16xf32> -> vector<8x16xf32>
    %cst_222 = arith.constant dense<0.000000e+00> : vector<8x16xf32>
    %736 = tpu.matmul %734, %731, %cst_222 {dimension_numbers = #tpu.dot_dimension_numbers<[1], [0], [0], [1], [0, 0, 1, 1], [], []>} : vector<8x8xf32>, vector<8x16xf32>, vector<8x16xf32> -> vector<8x16xf32>
    %cst_223 = arith.constant -2.500000e-01 : f32
    %737 = vector.broadcast %cst_223 : f32 to vector<8x16xf32>
    %738 = arith.mulf %737, %736 : vector<8x16xf32>
    %739 = arith.addf %735, %738 : vector<8x16xf32>
    %cst_224 = arith.constant 0.000000e+00 : f32
    %740 = vector.broadcast %cst_224 : f32 to vector<8x96xf32>
    %741 = tpu.concatenate %51, %739, %740 in 1 : vector<8x16xf32>, vector<8x16xf32>, vector<8x96xf32> -> vector<8x128xf32>
    %c0_225 = arith.constant 0 : index
    %c0_226 = arith.constant 0 : index
    %742 = vector.load %arg12[%c0_225, %c0_226] : memref<8x128xf32, #tpu.memory_space<vmem>>, vector<8x128xf32>
    tpu.vector_store %arg12[%c0_225, %c0_226], %741 {strides = array<i32>} : memref<8x128xf32, #tpu.memory_space<vmem>>, vector<8x128xf32>,
    return
  }
}

</mosaic_0001>

<bundles_post_ra>
// kernel: _lambda_.1
= control target key start
LH: loop header
LB: loop body
LE: loop exit
PB: predicated region body
PF: predicated region fallthrough
CT: control target
= control target key end

     0   :  { %v2317_v0 = vmov 0.0|0.0   ;;  %vm2318_vm0 = vmmov 0   ;;  %v2319_v4 = vmov 0.0   ;;  %vm48_vm1 = vcmask 261120   ;;  %s2320_s14 = smov 112   ;;  %s3069_s6 = inlined_call_operand.vmem [shape: f32[32,32], index: 6, kind: input, shape index: {}]   ;;  %s3070_s0 = inlined_call_operand.vmem [shape: f32[24,32], index: 0, kind: input, shape index: {}]   ;;  %s3071_s1 = inlined_call_operand.vmem [shape: bf16[8,8], index: 1, kind: input, shape index: {}]   ;;  %s3072_s11 = inlined_call_operand.vmem [shape: f32[1,16], index: 11, kind: input, shape index: {}]   ;;  %s3073_s2 = inlined_call_operand.vmem [shape: bf16[8,8], index: 2, kind: input, shape index: {}]   ;;  %s3074_s10 = inlined_call_operand.vmem [shape: f32[32,32], index: 10, kind: input, shape index: {}]   ;;  %s3075_s7 = inlined_call_operand.vmem [shape: f32[16,32], index: 7, kind: input, shape index: {}]   ;;  %s3076_s3 = inlined_call_operand.vmem [shape: bf16[8,8], index: 3, kind: input, shape index: {}]   ;;  %s3077_s4 = inlined_call_operand.vmem [shape: bf16[8,8], index: 4, kind: input, shape index: {}]   ;;  %s3078_s8 = inlined_call_operand.vmem [shape: f32[16,16], index: 8, kind: input, shape index: {}]   ;;  %s3079_s5 = inlined_call_operand.vmem [shape: bf16[8,8], index: 5, kind: input, shape index: {}]   ;;  %s3080_s9 = inlined_call_operand.vmem [shape: f32[1,16], index: 9, kind: input, shape index: {}]   ;;  %s3081_s12 = inlined_call_operand.vmem [shape: f32[8,128], index: 12, kind: output, shape index: {}]  }
   0x1   :  { %2252 = vmatprep.subr.bf16.mxu0 %v2317_v0  ;;  %v44_v1 = vld [vmem:[%s3069_s6] sm:$0xff]  ;;  %v45_v2 = vld [vmem:[%s3069_s6 + $0x8] sm:$0xff]  ;;  %v46_v3 = vld [vmem:[%s3069_s6 + $0x10] sm:$0xff]  ;;  %2156 = vmatprep.mubr.msk.f32.mxu0 %vm2318_vm0, %v2319_v4  ;;  %vm138_vm2 = vcmask 64512   ;;  %vm379_vm3 = vcmask 130048   ;;  %v826_v45 = vlaneseq }
   0x2   :  { %v2253_v5 = vpack.c.bf16 %v45_v2, %v44_v1  ;;  %v47_v6 = vld [vmem:[%s3069_s6 + $0x18] sm:$0xff]  ;;  %2165 = vmatprep.subr.mxu1 %v2319_v4  ;;  %2167 = vmatprep.mubr.msk.f32.mxu1 %vm2318_vm0, %v2319_v4  ;;  %v41_v8 = vld [vmem:[%s3070_s0] sm:$0xff]  ;;  %v294_v16 = vld [vmem:[%s3074_s10 + $0x8] sm:$0xff] }
   0x3   :  { %v2256_v7 = vpack.c.bf16 %v47_v6, %v46_v3  ;;  %v136_v9 = vld [vmem:[%s3071_s1] sm:$0xf]  ;;  %s2321_s1 = smov 16   ;;  %v295_v20 = vld [vmem:[%s3074_s10 + $0x10] sm:$0xff]  ;;  %v296_v21 = vld [vmem:[%s3074_s10 + $0x18] sm:$0xff]  ;;  %v2488_v46 = vand.u32 127, %v826_v45 }
   0x4   :  { %2254 = vmatpush3.bf16.msra.mxu0 %v2253_v5  ;;  %v137_v10 = vunpack.c.l.bf16 %v136_v9  ;;  %v2084_v13 = vld [vmem:[%s3072_s11] ss:$0 sm:$0xff]  ;;  %v2262_v22 = vpack.c.bf16 %v296_v21, %v295_v20  ;;  %v378_v24 = vld [vmem:[%s3075_s7 + $0x8] sm:$0xff]  ;;  %v2490_v47 = vshrl.u32 %v826_v45, 7 }
   0x5   :  { %2255 = vmatprep.subr.bf16.mxu0 %v2317_v0  ;;  %v213_v14 = vld [vmem:[%s3073_s2] sm:$0xf]  ;;  %vm843_vm6 = vcmp.eq.s32.totalorder %v2488_v46, 0  ;;  %vm896_vm8 = vcmp.eq.s32.totalorder %v2488_v46, 1  ;;  %vm949_vm11 = vcmp.eq.s32.totalorder %v2488_v46, 2  ;;  %vm1002_vm13 = vcmp.eq.s32.totalorder %v2488_v46, 3 }
   0x6   :  { %v293_v15 = vld [vmem:[%s3074_s10] sm:$0xff]  ;;  %v214_v17 = vunpack.c.l.bf16 %v213_v14  ;;  %vm831_vm4 = vcmp.eq.s32.totalorder %v2490_v47, %v2488_v46  ;;  %vm841_vm5 = vcmp.eq.s32.totalorder %v2490_v47, 0  ;;  %vm894_vm7 = vcmp.eq.s32.totalorder %v2490_v47, 1 }
   0x7   :  { %v2259_v18 = vpack.c.bf16 %v294_v16, %v293_v15  ;;  %v377_v23 = vld [vmem:[%s3075_s7] sm:$0xff]  ;;  %v2495_v50 = vsel %vm831_vm4, 1.0, %v2319_v4  ;;  %v2528_v16 = vadd.s32 8, %v2490_v47  ;;  %vm947_vm10 = vcmp.eq.s32.totalorder %v2490_v47, 2 }
   0x8   :  { %2257 = vmatpush3.bf16.msra.mxu0 %v2256_v7  ;;  %v2265_v25 = vpack.c.bf16 %v378_v24, %v377_v23  ;;  %vm1000_vm12 = vcmp.eq.s32.totalorder %v2490_v47, 3  ;;  %vm1053_vm14 = vcmp.eq.s32.totalorder %v2490_v47, 4  ;;  %vm1055_vm15 = vcmp.eq.s32.totalorder %v2488_v46, 4 }
   0x9   :  { %2199 = vmatprep.subr.mxu0 %v2319_v4  ;;  %vm832_vm9 = vcmp.eq.s32.totalorder %v2528_v16, %v2488_v46  ;;  %vm1106_vm4 = vcmp.eq.s32.totalorder %v2490_v47, 5 }
   0xa   :  { %v2533_v21 = vsel %vm832_vm9, 1.0, %v2319_v4  ;;  %vm1214_vm9 = vcmp.eq.s32.totalorder %v2488_v46, 7 }
   0xb   :  { %2157 = vmatmul.mubr.msk.f32.vlgmr.msra.gmra.mrb[0].mxu0 %vm48_vm1, %v41_v8 }
   0xc   :  { %2159 = vmatprep.mubr.msk.f32.mxu0 %vm2318_vm0, %v2319_v4 }
  0xde   :  { %v124_v11 = vpop.f32.mrb[0].mxu0 }
  0xdf   :  { %216 = vrot.lane.b32.xlu0 %v124_v11, %s2320_s14  ;;  %v2158_v12 = vpop.f32.mrb[1].mxu0  ;;  %2166 = vmatpush3.msra.mxu1 %v124_v11 }
  0xe0   :  { %2168 = vmatmul.mubr.msk.f32.vlgmr.msra.gmra.mrb[0].mxu1 %vm138_vm2, %v137_v10  ;;  %2170 = vmatprep.subr.mxu1 %v2319_v4 }
  0xe1   :  { %2172 = vmatprep.mubr.msk.f32.mxu1 %vm2318_vm0, %v2319_v4 }
  0xe3   :  { %373 = vrot.lane.b32.xlu0 %v2084_v13, %s2321_s1 }
 0x151   :  { %v217_v19 = vpop.permute.xlu0 %216 }
 0x152   :  { %2171 = vmatpush3.msra.mxu1 %v217_v19 }
 0x153   :  { %2173 = vmatmul.mubr.msk.f32.vlgmr.msra.gmra.mrb[2].mxu1 %vm138_vm2, %v214_v17  ;;  %2258 = vmatprep.subr.bf16.mxu1 %v2317_v0 }
 0x154   :  { %2260 = vmatpush3.bf16.msra.mxu1 %v2259_v18  ;;  %2183 = vmatprep.mubr.msk.f32.mxu1 %vm2318_vm0, %v2319_v4 }
 0x155   :  { %2261 = vmatprep.subr.bf16.mxu1 %v2317_v0  ;;  %v374_v32 = vpop.permute.xlu0 %373 }
 0x158   :  { %2263 = vmatpush3.bf16.msra.mxu1 %v2262_v22 }
 0x159   :  { %2264 = vmatprep.subr.bf16.mxu1 %v2317_v0 }
 0x15b   :  { %2184 = vmatmul.mubr.msk.f32.vlgmr.msra.gmra.mrb[4].mxu1 %vm48_vm1, %v41_v8 }
 0x15c   :  { %2266 = vmatpush3.bf16.msra.mxu1 %v2265_v25  ;;  %2190 = vmatprep.mubr.msk.f32.mxu1 %vm2318_vm0, %v2319_v4 }
 0x15f   :  { %2191 = vmatmul.mubr.f32.vlgmr.msra.gmra.mrb[6].mxu1 %v2319_v4 }
 0x160   :  { %2193 = vmatprep.mubr.msk.f32.mxu1 %vm2318_vm0, %v2319_v4 }
 0x1b3   :  { %v208_v26 = vpop.f32.mrb[0].mxu1 }
 0x1b4   :  { %v212_v27 = vmax.f32 %v208_v26, 0.0  ;;  %v2169_v28 = vpop.f32.mrb[1].mxu1 }
 0x1b6   :  { %2194 = vmatmul.mubr.msk.f32.gmra.mrb[8].mxu1 %vm379_vm3, %v212_v27 }
 0x1b7   :  { %2196 = vmatprep.mubr.msk.f32.mxu1 %vm2318_vm0, %v2319_v4 }
 0x226   :  { %v288_v29 = vpop.f32.mrb[2].mxu1 }
 0x227   :  { %v292_v30 = vmax.f32 %v288_v29, 0.0  ;;  %v2174_v31 = vpop.f32.mrb[3].mxu1 }
 0x229   :  { %2197 = vmatmul.mubr.msk.f32.gmra.mrb[10].mxu1 %vm379_vm3, %v292_v30 }
 0x22e   :  { %v2462_v33 = vpop.f32.mrb[4].mxu1 }
 0x22f   :  { %v2185_v34 = vpop.f32.mrb[5].mxu1  ;;  %v2465_v35 = vadd.f32 %v374_v32, %v2462_v33 }
 0x231   :  { %710 = vrot.lane.b32.xlu1 %v2465_v35, %s2320_s14 }
 0x232   :  { %v455_v36 = vpop.f32.mrb[6].mxu1 }
 0x233   :  { %v2192_v37 = vpop.f32.mrb[7].mxu1 }
 0x289   :  { %v459_v38 = vpop.f32.mrb[8].mxu1 }
 0x28a   :  { %v2195_v39 = vpop.f32.mrb[9].mxu1  ;;  %2200 = vmatpush3.msra.mxu0 %v459_v38 }
 0x28b   :  { %2204 = vmatprep.subr.mxu0 %v2319_v4 }
 0x2a3   :  { %v2470_v40 = vpop.permute.xlu1 %710 }
 0x2a4   :  { %2216 = vmatprep.subr.mxu1 %v2470_v40  ;;  %713 = vxpose.xlu1.b32.start.end [1/1] (short) (narrow) %v2470_v40, 16 }
 0x2a5   :  { %2217 = vmatpush3.msra.mxu1 %v2470_v40 }
 0x2a6   :  { %2274 = vmatprep.subr.bf16.mxu1 %v2317_v0 }
 0x2fc   :  { %v2476_v41 = vpop.f32.mrb[10].mxu1 }
 0x2fd   :  { %v2198_v42 = vpop.f32.mrb[11].mxu1 }
 0x324   :  { %v2478_v43 = vpop.trf.xlu1 }
 0x325   :  { %2218 = vmatprep.mubr.msk.f32.mxu1 %vm138_vm2, %v2478_v43 }
 0x328   :  { %v2482_v44 = vpop.trf.xlu1 }
 0x329   :  { %2219 = vmatmul.mubr.msk.f32.vlgmr.msra.gmra.mrb[12].mxu1 %vm138_vm2, %v2482_v44 }
 0x32a   :  { %2232 = vmatprep.mubr.msk.f32.mxu1 %vm2318_vm0, %v2319_v4 }
 0x3fc   :  { %v2220_v48 = vpop.f32.mrb[12].mxu1 }
 0x3fd   :  { %v817_v49 = vpop.f32.mrb[13].mxu1  ;;  %v838_v19 = vmul.f32 0.5, %v2220_v48 }
 0x3fe   :  { %v837_v51 = vmul.f32 0.5, %v817_v49  ;;  %v2497_v52 = vpack.c.bf16 %v2220_v48, %v817_v49 }
 0x3ff   :  { %v840_v24 = vadd.f32 %v2533_v21, %v838_v19 }
 0x400   :  { %v839_v53 = vadd.f32 %v2495_v50, %v837_v51 }
 0x401   :  { %v875_v27 = vsel %vm843_vm6, %v840_v24, 0.0 }
 0x402   :  { %v844_v54 = vsel %vm841_vm5, %v839_v53, 0.0  ;;  %v874_v1 = vsel %vm843_vm6, %v839_v53, 0.0  ;;  %v879_v28 = vsel %vm379_vm3, %v875_v27, 0.0 }
 0x403   :  { %v846_v55 = vsel %vm379_vm3, %v844_v54, 0.0  ;;  %v876_v2 = vsel %vm379_vm3, %v874_v1, 0.0 }
 0x404   :  { %v849_v56 = vrot.slane %v846_v55, 4 }
 0x406   :  { %v850_v57 = vadd.f32 %v849_v56, %v846_v55 }
 0x408   :  { %v851_v58 = vrot.slane %v850_v57, 2 }
 0x40a   :  { %v852_v59 = vadd.f32 %v851_v58, %v850_v57 }
 0x40c   :  { %v853_v60 = vrot.slane %v852_v59, 1 }
 0x40e   :  { %v854_v61 = vadd.f32 %v853_v60, %v852_v59 }
 0x410   :  { %v866_v62 = vsel %vm843_vm6, %v854_v61, 0.0  ;;  %vm1159_vm6 = vcmp.eq.s32.totalorder %v2490_v47, 6 }
 0x411   :  { %v867_v63 = vsel %vm379_vm3, %v866_v62, 0.0 }
 0x412   :  { %868 = vadd.xlane.f32.xlu0 %v867_v63 }
 0x416   :  { %877 = vadd.xlane.f32.xlu0 %v876_v2 }
 0x49f   :  { %v869_v3 = vpop.xlane.xlu0 %868 }
 0x4a0   :  { %2285 = vrcp.f32 %v869_v3 }
 0x4a3   :  { %v2514_v7 = vpop.xlane.xlu0 %877 }
 0x4aa   :  { %v2511_v5 = vpop.eup %2285 }
 0x4ab   :  { %v872_v6 = vmul.f32 %v2511_v5, %v854_v61 }
 0x4ad   :  { %v882_v8 = vmul.f32 %v2514_v7, %v872_v6 }
 0x4af   :  { %v884_v9 = vsub.f32 %v839_v53, %v882_v8 }
 0x4b1   :  { %v886_v10 = vsel %vm841_vm5, %v872_v6, %v884_v9 }
 0x4b2   :  { %v927_v11 = vsel %vm896_vm8, %v886_v10, 0.0  ;;  %v897_v12 = vsel %vm894_vm7, %v886_v10, 0.0 }
 0x4b3   :  { %v929_v13 = vsel %vm379_vm3, %v927_v11, 0.0  ;;  %v899_v14 = vsel %vm379_vm3, %v897_v12, 0.0 }
 0x4b4   :  { %930 = vadd.xlane.f32.xlu1 %v929_v13  ;;  %v902_v15 = vrot.slane %v899_v14, 4 }
 0x4b6   :  { %v903_v17 = vadd.f32 %v902_v15, %v899_v14 }
 0x4b8   :  { %v904_v18 = vrot.slane %v903_v17, 2 }
 0x4ba   :  { %v905_v20 = vadd.f32 %v904_v18, %v903_v17  ;;  %v855_v18 = vsel %vm841_vm5, %v2495_v50, 0.0 }
 0x4bc   :  { %v906_v22 = vrot.slane %v905_v20, 1 }
 0x4be   :  { %v907_v23 = vadd.f32 %v906_v22, %v905_v20 }
 0x4c0   :  { %v919_v25 = vsel %vm896_vm8, %v907_v23, 0.0 }
 0x4c1   :  { %v920_v26 = vsel %vm379_vm3, %v919_v25, 0.0 }
 0x4c2   :  { %921 = vadd.xlane.f32.xlu0 %v920_v26 }
 0x4c6   :  { %880 = vadd.xlane.f32.xlu0 %v879_v28 }
 0x541   :  { %v2545_v32 = vpop.xlane.xlu1 %930 }
 0x54f   :  { %v922_v29 = vpop.xlane.xlu0 %921 }
 0x550   :  { %2287 = vrcp.f32 %v922_v29 }
 0x553   :  { %v2554_v51 = vpop.xlane.xlu0 %880 }
 0x554   :  { %v883_v54 = vmul.f32 %v2554_v51, %v872_v6 }
 0x556   :  { %v885_v59 = vsub.f32 %v840_v24, %v883_v54 }
 0x558   :  { %v928_v61 = vsel %vm896_vm8, %v885_v59, 0.0  ;;  %vm1212_vm8 = vcmp.eq.s32.totalorder %v2490_v47, 7 }
 0x559   :  { %v932_v62 = vsel %vm379_vm3, %v928_v61, 0.0 }
 0x55a   :  { %v2542_v30 = vpop.eup %2287 }
 0x55b   :  { %v925_v31 = vmul.f32 %v2542_v30, %v907_v23  ;;  %v857_v23 = vsel %vm379_vm3, %v855_v18, 0.0 }
 0x55c   :  { %v860_v26 = vrot.slane %v857_v23, 4 }
 0x55d   :  { %v935_v34 = vmul.f32 %v2545_v32, %v925_v31 }
 0x55f   :  { %v937_v36 = vsub.f32 %v886_v10, %v935_v34 }
 0x561   :  { %v939_v37 = vsel %vm894_vm7, %v925_v31, %v937_v36 }
 0x562   :  { %v950_v38 = vsel %vm947_vm10, %v939_v37, 0.0  ;;  %v980_v58 = vsel %vm949_vm11, %v939_v37, 0.0 }
 0x563   :  { %v952_v39 = vsel %vm379_vm3, %v950_v38, 0.0  ;;  %v982_v60 = vsel %vm379_vm3, %v980_v58, 0.0 }
 0x564   :  { %v955_v42 = vrot.slane %v952_v39, 4 }
 0x566   :  { %v956_v45 = vadd.f32 %v955_v42, %v952_v39 }
 0x568   :  { %v957_v48 = vrot.slane %v956_v45, 2 }
 0x56a   :  { %v958_v49 = vadd.f32 %v957_v48, %v956_v45 }
 0x56c   :  { %v959_v53 = vrot.slane %v958_v49, 1 }
 0x56e   :  { %v960_v55 = vadd.f32 %v959_v53, %v958_v49 }
 0x570   :  { %v972_v56 = vsel %vm949_vm11, %v960_v55, 0.0 }
 0x571   :  { %v973_v57 = vsel %vm379_vm3, %v972_v56, 0.0 }
 0x572   :  { %974 = vadd.xlane.f32.xlu0 %v973_v57 }
 0x576   :  { %983 = vadd.xlane.f32.xlu0 %v982_v60 }
 0x57a   :  { %933 = vadd.xlane.f32.xlu0 %v932_v62 }
 0x5ff   :  { %v975_v63 = vpop.xlane.xlu0 %974 }
 0x600   :  { %2289 = vrcp.f32 %v975_v63 }
 0x603   :  { %v984_v3 = vpop.xlane.xlu0 %983 }
 0x607   :  { %v2580_v17 = vpop.xlane.xlu0 %933 }
 0x608   :  { %v936_v20 = vmul.f32 %v2580_v17, %v925_v31  ;;  %v861_v31 = vadd.f32 %v860_v26, %v857_v23 }
 0x60a   :  { %v2290_v1 = vpop.eup %2289  ;;  %v2594_v28 = vsub.f32 %v885_v59, %v936_v20 }
 0x60b   :  { %v2567_v2 = vmul.f32 %v2290_v1, %v960_v55 }
 0x60c   :  { %v981_v34 = vsel %vm949_vm11, %v2594_v28, 0.0  ;;  %vm1267_vm11 = vcmp.eq.s32.totalorder %v2488_v46, 8 }
 0x60d   :  { %v988_v6 = vmul.f32 %v984_v3, %v2567_v2  ;;  %v985_v36 = vsel %vm379_vm3, %v981_v34, 0.0 }
 0x60f   :  { %v990_v8 = vsub.f32 %v939_v37, %v988_v6  ;;  %v862_v37 = vrot.slane %v861_v31, 2 }
 0x611   :  { %v2574_v9 = vsel %vm947_vm10, %v2567_v2, %v990_v8  ;;  %v863_v38 = vadd.f32 %v862_v37, %v861_v31 }
 0x612   :  { %v1003_v10 = vsel %vm1000_vm12, %v2574_v9, 0.0  ;;  %v1033_v27 = vsel %vm1002_vm13, %v2574_v9, 0.0 }
 0x613   :  { %v1005_v11 = vsel %vm379_vm3, %v1003_v10, 0.0  ;;  %v1035_v29 = vsel %vm379_vm3, %v1033_v27, 0.0  ;;  %v864_v39 = vrot.slane %v863_v38, 1 }
 0x614   :  { %v1008_v12 = vrot.slane %v1005_v11, 4 }
 0x615   :  { %v865_v42 = vadd.f32 %v864_v39, %v863_v38 }
 0x616   :  { %v1009_v13 = vadd.f32 %v1008_v12, %v1005_v11 }
 0x617   :  { %v2602_v45 = vmul.f32 %v2511_v5, %v865_v42 }
 0x618   :  { %v1010_v14 = vrot.slane %v1009_v13, 2 }
 0x619   :  { %v888_v48 = vmul.f32 %v2514_v7, %v2602_v45 }
 0x61a   :  { %v1011_v15 = vadd.f32 %v1010_v14, %v1009_v13 }
 0x61b   :  { %v890_v49 = vsub.f32 %v2495_v50, %v888_v48 }
 0x61c   :  { %v1012_v19 = vrot.slane %v1011_v15, 1 }
 0x61d   :  { %v892_v53 = vsel %vm841_vm5, %v2602_v45, %v890_v49  ;;  %vm1108_vm5 = vcmp.eq.s32.totalorder %v2488_v46, 5 }
 0x61e   :  { %v1013_v22 = vadd.f32 %v1012_v19, %v1011_v15  ;;  %v908_v54 = vsel %vm894_vm7, %v892_v53, 0.0 }
 0x61f   :  { %v910_v55 = vsel %vm379_vm3, %v908_v54, 0.0 }
 0x620   :  { %v1025_v24 = vsel %vm1002_vm13, %v1013_v22, 0.0  ;;  %v913_v56 = vrot.slane %v910_v55, 4 }
 0x621   :  { %v1026_v25 = vsel %vm379_vm3, %v1025_v24, 0.0 }
 0x622   :  { %1027 = vadd.xlane.f32.xlu0 %v1026_v25  ;;  %v914_v57 = vadd.f32 %v913_v56, %v910_v55 }
 0x624   :  { %v915_v58 = vrot.slane %v914_v57, 2 }
 0x626   :  { %1036 = vadd.xlane.f32.xlu0 %v1035_v29  ;;  %v916_v59 = vadd.f32 %v915_v58, %v914_v57 }
 0x628   :  { %v917_v5 = vrot.slane %v916_v59, 1 }
 0x62a   :  { %986 = vadd.xlane.f32.xlu0 %v985_v36  ;;  %v918_v60 = vadd.f32 %v917_v5, %v916_v59 }
 0x62c   :  { %v2614_v61 = vmul.f32 %v2542_v30, %v918_v60 }
 0x62e   :  { %v941_v50 = vmul.f32 %v2545_v32, %v2614_v61 }
 0x630   :  { %v943_v7 = vsub.f32 %v892_v53, %v941_v50 }
 0x632   :  { %v945_v62 = vsel %vm894_vm7, %v2614_v61, %v943_v7  ;;  %vm1161_vm7 = vcmp.eq.s32.totalorder %v2488_v46, 6 }
 0x633   :  { %v961_v63 = vsel %vm947_vm10, %v945_v62, 0.0 }
 0x634   :  { %v963_v6 = vsel %vm379_vm3, %v961_v63, 0.0 }
 0x635   :  { %v966_v8 = vrot.slane %v963_v6, 4 }
 0x637   :  { %v967_v10 = vadd.f32 %v966_v8, %v963_v6 }
 0x639   :  { %v968_v11 = vrot.slane %v967_v10, 2 }
 0x63b   :  { %v969_v12 = vadd.f32 %v968_v11, %v967_v10 }
 0x63d   :  { %v970_v13 = vrot.slane %v969_v12, 1 }
 0x63f   :  { %v971_v30 = vadd.f32 %v970_v13, %v969_v12 }
 0x641   :  { %v2624_v14 = vmul.f32 %v2290_v1, %v971_v30 }
 0x643   :  { %v994_v32 = vmul.f32 %v984_v3, %v2624_v14 }
 0x645   :  { %v996_v15 = vsub.f32 %v945_v62, %v994_v32 }
 0x647   :  { %v998_v18 = vsel %vm947_vm10, %v2624_v14, %v996_v15  ;;  %vm1266_vm10 = vcmp.eq.s32.totalorder %v2528_v16, 8 }
 0x648   :  { %v1014_v19 = vsel %vm1000_vm12, %v998_v18, 0.0 }
 0x649   :  { %v1016_v20 = vsel %vm379_vm3, %v1014_v19, 0.0 }
 0x64a   :  { %v1019_v23 = vrot.slane %v1016_v20, 4 }
 0x64c   :  { %v1020_v24 = vadd.f32 %v1019_v23, %v1016_v20 }
 0x64e   :  { %v1021_v25 = vrot.slane %v1020_v24, 2 }
 0x650   :  { %v1022_v27 = vadd.f32 %v1021_v25, %v1020_v24 }
 0x652   :  { %v1023_v1 = vrot.slane %v1022_v27, 1 }
 0x654   :  { %v1024_v29 = vadd.f32 %v1023_v1, %v1022_v27 }
 0x6af   :  { %v1028_v26 = vpop.xlane.xlu0 %1027 }
 0x6b0   :  { %2291 = vrcp.f32 %v1028_v26 }
 0x6b3   :  { %v1037_v36 = vpop.xlane.xlu0 %1036 }
 0x6b7   :  { %v2643_v57 = vpop.xlane.xlu0 %986 }
 0x6ba   :  { %v2292_v31 = vpop.eup %2291 }
 0x6bb   :  { %v1031_v3 = vmul.f32 %v2292_v31, %v1013_v22  ;;  %v2633_v34 = vmul.f32 %v2292_v31, %v1024_v29 }
 0x6bd   :  { %v1041_v37 = vmul.f32 %v1037_v36, %v1031_v3  ;;  %v1047_v38 = vmul.f32 %v1037_v36, %v2633_v34 }
 0x6bf   :  { %v1043_v39 = vsub.f32 %v2574_v9, %v1041_v37  ;;  %v1049_v42 = vsub.f32 %v998_v18, %v1047_v38  ;;  %v989_v9 = vmul.f32 %v2643_v57, %v2567_v2 }
 0x6c1   :  { %v1045_v48 = vsel %vm1000_vm12, %v1031_v3, %v1043_v39  ;;  %v991_v7 = vsub.f32 %v2594_v28, %v989_v9  ;;  %v1051_v6 = vsel %vm1000_vm12, %v2633_v34, %v1049_v42  ;;  %vm1319_vm12 = vcmp.eq.s32.totalorder %v2528_v16, 9 }
 0x6c2   :  { %v1056_v49 = vsel %vm1053_vm14, %v1045_v48, 0.0  ;;  %v1086_v50 = vsel %vm1055_vm15, %v1045_v48, 0.0  ;;  %v1067_v8 = vsel %vm1053_vm14, %v1051_v6, 0.0 }
 0x6c3   :  { %v1058_v53 = vsel %vm379_vm3, %v1056_v49, 0.0  ;;  %v1088_v62 = vsel %vm379_vm3, %v1086_v50, 0.0  ;;  %v1034_v2 = vsel %vm1002_vm13, %v991_v7, 0.0  ;;  %v1069_v10 = vsel %vm379_vm3, %v1067_v8, 0.0 }
 0x6c4   :  { %v1061_v22 = vrot.slane %v1058_v53, 4  ;;  %v1038_v63 = vsel %vm379_vm3, %v1034_v2, 0.0  ;;  %v1072_v11 = vrot.slane %v1069_v10, 4  ;;  %vm1320_vm13 = vcmp.eq.s32.totalorder %v2488_v46, 9 }
 0x6c6   :  { %v1062_v54 = vadd.f32 %v1061_v22, %v1058_v53  ;;  %v1073_v28 = vadd.f32 %v1072_v11, %v1069_v10 }
 0x6c8   :  { %v1063_v55 = vrot.slane %v1062_v54, 2  ;;  %v1074_v12 = vrot.slane %v1073_v28, 2 }
 0x6ca   :  { %v1064_v56 = vadd.f32 %v1063_v55, %v1062_v54  ;;  %v1075_v30 = vadd.f32 %v1074_v12, %v1073_v28 }
 0x6cc   :  { %v1065_v58 = vrot.slane %v1064_v56, 1  ;;  %v1076_v15 = vrot.slane %v1075_v30, 1 }
 0x6ce   :  { %v1066_v59 = vadd.f32 %v1065_v58, %v1064_v56  ;;  %v1077_v20 = vadd.f32 %v1076_v15, %v1075_v30 }
 0x6d0   :  { %v1078_v5 = vsel %vm1055_vm15, %v1066_v59, 0.0 }
 0x6d1   :  { %v1079_v60 = vsel %vm379_vm3, %v1078_v5, 0.0 }
 0x6d2   :  { %1080 = vadd.xlane.f32.xlu0 %v1079_v60 }
 0x6d6   :  { %1089 = vadd.xlane.f32.xlu0 %v1088_v62 }
 0x6da   :  { %1039 = vadd.xlane.f32.xlu0 %v1038_v63 }
 0x75f   :  { %v1081_v13 = vpop.xlane.xlu0 %1080 }
 0x760   :  { %2293 = vrcp.f32 %v1081_v13 }
 0x763   :  { %v1090_v32 = vpop.xlane.xlu0 %1089 }
 0x767   :  { %v2664_v18 = vpop.xlane.xlu0 %1039 }
 0x768   :  { %v1042_v19 = vmul.f32 %v2664_v18, %v1031_v3 }
 0x76a   :  { %v2294_v23 = vpop.eup %2293  ;;  %v1044_v24 = vsub.f32 %v991_v7, %v1042_v19 }
 0x76b   :  { %v1084_v25 = vmul.f32 %v2294_v23, %v1066_v59  ;;  %v1085_v26 = vmul.f32 %v2294_v23, %v1077_v20 }
 0x76c   :  { %v1087_v27 = vsel %vm1055_vm15, %v1044_v24, 0.0  ;;  %vm1373_vm15 = vcmp.eq.s32.totalorder %v2488_v46, 10 }
 0x76d   :  { %v1094_v1 = vmul.f32 %v1090_v32, %v1084_v25  ;;  %v1100_v29 = vmul.f32 %v1090_v32, %v1085_v26  ;;  %v1091_v31 = vsel %vm379_vm3, %v1087_v27, 0.0 }
 0x76e   :  { %1092 = vadd.xlane.f32.xlu0 %v1091_v31 }
 0x76f   :  { %v1096_v36 = vsub.f32 %v1045_v48, %v1094_v1  ;;  %v1102_v37 = vsub.f32 %v1051_v6, %v1100_v29 }
 0x771   :  { %v1104_v3 = vsel %vm1053_vm14, %v1085_v26, %v1102_v37  ;;  %v1098_v38 = vsel %vm1053_vm14, %v1084_v25, %v1096_v36  ;;  %vm1372_vm14 = vcmp.eq.s32.totalorder %v2528_v16, 10 }
 0x772   :  { %v1109_v39 = vsel %vm1106_vm4, %v1098_v38, 0.0  ;;  %v1139_v42 = vsel %vm1108_vm5, %v1098_v38, 0.0  ;;  %v1120_v62 = vsel %vm1106_vm4, %v1104_v3, 0.0 }
 0x773   :  { %v1111_v49 = vsel %vm379_vm3, %v1109_v39, 0.0  ;;  %v1141_v53 = vsel %vm379_vm3, %v1139_v42, 0.0  ;;  %v1122_v6 = vsel %vm379_vm3, %v1120_v62, 0.0 }
 0x774   :  { %v1114_v48 = vrot.slane %v1111_v49, 4  ;;  %1142 = vadd.xlane.f32.xlu0 %v1141_v53  ;;  %v1125_v8 = vrot.slane %v1122_v6, 4 }
 0x776   :  { %v1115_v22 = vadd.f32 %v1114_v48, %v1111_v49  ;;  %v1126_v10 = vadd.f32 %v1125_v8, %v1122_v6 }
 0x778   :  { %v1116_v54 = vrot.slane %v1115_v22, 2  ;;  %v1127_v11 = vrot.slane %v1126_v10, 2 }
 0x77a   :  { %v1117_v55 = vadd.f32 %v1116_v54, %v1115_v22  ;;  %v1128_v12 = vadd.f32 %v1127_v11, %v1126_v10  ;;  %v889_v54 = vmul.f32 %v2554_v51, %v2602_v45 }
 0x77c   :  { %v1118_v56 = vrot.slane %v1117_v55, 1  ;;  %v1129_v13 = vrot.slane %v1128_v12, 1 }
 0x77e   :  { %v1119_v58 = vadd.f32 %v1118_v56, %v1117_v55  ;;  %v1130_v30 = vadd.f32 %v1129_v13, %v1128_v12  ;;  %v942_v55 = vmul.f32 %v2580_v17, %v2614_v61  ;;  %v891_v56 = vsub.f32 %v2533_v21, %v889_v54 }
 0x780   :  { %v1131_v9 = vsel %vm1108_vm5, %v1119_v58, 0.0 }
 0x781   :  { %v1132_v59 = vsel %vm379_vm3, %v1131_v9, 0.0  ;;  %v944_v9 = vsub.f32 %v891_v56, %v942_v55 }
 0x782   :  { %1133 = vadd.xlane.f32.xlu1 %v1132_v59  ;;  %v1048_v59 = vmul.f32 %v2664_v18, %v2633_v34 }
 0x7fb   :  { %v1093_v5 = vpop.xlane.xlu0 %1092 }
 0x7fc   :  { %v1095_v60 = vmul.f32 %v1093_v5, %v1084_v25  ;;  %v1101_v50 = vmul.f32 %v1093_v5, %v1085_v26 }
 0x7fe   :  { %v1097_v7 = vsub.f32 %v1044_v24, %v1095_v60 }
 0x800   :  { %v1140_v2 = vsel %vm1108_vm5, %v1097_v7, 0.0  ;;  %vm1426_vm5 = vcmp.eq.s32.totalorder %v2488_v46, 11 }
 0x801   :  { %v1144_v63 = vsel %vm379_vm3, %v1140_v2, 0.0  ;;  %v1143_v20 = vpop.xlane.xlu0 %1142 }
 0x802   :  { %1145 = vadd.xlane.f32.xlu1 %v1144_v63 }
 0x80f   :  { %v1134_v28 = vpop.xlane.xlu1 %1133 }
 0x810   :  { %2295 = vrcp.f32 %v1134_v28 }
 0x81a   :  { %v2296_v32 = vpop.eup %2295 }
 0x81b   :  { %v1138_v15 = vmul.f32 %v2296_v32, %v1130_v30  ;;  %v1137_v19 = vmul.f32 %v2296_v32, %v1119_v58  ;;  %v995_v58 = vmul.f32 %v2643_v57, %v2624_v14 }
 0x81d   :  { %v1153_v23 = vmul.f32 %v1143_v20, %v1138_v15  ;;  %v1147_v24 = vmul.f32 %v1143_v20, %v1137_v19  ;;  %v997_v5 = vsub.f32 %v944_v9, %v995_v58 }
 0x81f   :  { %v1155_v25 = vsub.f32 %v1104_v3, %v1153_v23  ;;  %v1149_v26 = vsub.f32 %v1098_v38, %v1147_v24  ;;  %v1050_v60 = vsub.f32 %v997_v5, %v1048_v59 }
 0x821   :  { %v1151_v27 = vsel %vm1106_vm4, %v1137_v19, %v1149_v26  ;;  %v1157_v1 = vsel %vm1106_vm4, %v1138_v15, %v1155_v25  ;;  %v1103_v2 = vsub.f32 %v1050_v60, %v1101_v50  ;;  %vm1425_vm4 = vcmp.eq.s32.totalorder %v2528_v16, 11 }
 0x822   :  { %v1192_v29 = vsel %vm1161_vm7, %v1151_v27, 0.0  ;;  %v1162_v31 = vsel %vm1159_vm6, %v1151_v27, 0.0  ;;  %v1173_v45 = vsel %vm1159_vm6, %v1157_v1, 0.0 }
 0x823   :  { %v1194_v36 = vsel %vm379_vm3, %v1192_v29, 0.0  ;;  %v1164_v37 = vsel %vm379_vm3, %v1162_v31, 0.0  ;;  %v1175_v61 = vsel %vm379_vm3, %v1173_v45, 0.0 }
 0x824   :  { %1195 = vadd.xlane.f32.xlu1 %v1194_v36  ;;  %v1167_v3 = vrot.slane %v1164_v37, 4  ;;  %v1178_v14 = vrot.slane %v1175_v61, 4 }
 0x826   :  { %v1168_v38 = vadd.f32 %v1167_v3, %v1164_v37  ;;  %v1179_v34 = vadd.f32 %v1178_v14, %v1175_v61 }
 0x828   :  { %v1169_v39 = vrot.slane %v1168_v38, 2  ;;  %v1180_v57 = vrot.slane %v1179_v34, 2 }
 0x82a   :  { %v1170_v42 = vadd.f32 %v1169_v39, %v1168_v38  ;;  %v1181_v50 = vadd.f32 %v1180_v57, %v1179_v34 }
 0x82c   :  { %v1171_v49 = vrot.slane %v1170_v42, 1  ;;  %v1182_v10 = vrot.slane %v1181_v50, 1 }
 0x82e   :  { %v1172_v53 = vadd.f32 %v1171_v49, %v1170_v42  ;;  %v1183_v11 = vadd.f32 %v1182_v10, %v1181_v50 }
 0x830   :  { %v1184_v48 = vsel %vm1161_vm7, %v1172_v53, 0.0 }
 0x831   :  { %v1185_v22 = vsel %vm379_vm3, %v1184_v48, 0.0 }
 0x832   :  { %1186 = vadd.xlane.f32.xlu0 %v1185_v22 }
 0x88f   :  { %v1146_v62 = vpop.xlane.xlu1 %1145 }
 0x890   :  { %v1148_v63 = vmul.f32 %v1146_v62, %v1137_v19  ;;  %v1154_v6 = vmul.f32 %v1146_v62, %v1138_v15 }
 0x892   :  { %v2715_v8 = vsub.f32 %v1103_v2, %v1154_v6  ;;  %v1150_v51 = vsub.f32 %v1097_v7, %v1148_v63 }
 0x894   :  { %v1193_v17 = vsel %vm1161_vm7, %v1150_v51, 0.0  ;;  %vm1479_vm7 = vcmp.eq.s32.totalorder %v2488_v46, 12 }
 0x895   :  { %v1197_v21 = vsel %vm379_vm3, %v1193_v17, 0.0 }
 0x896   :  { %1198 = vadd.xlane.f32.xlu0 %v1197_v21 }
 0x8b1   :  { %v1196_v13 = vpop.xlane.xlu1 %1195 }
 0x8bf   :  { %v1187_v18 = vpop.xlane.xlu0 %1186 }
 0x8c0   :  { %2297 = vrcp.f32 %v1187_v18 }
 0x8ca   :  { %v2298_v7 = vpop.eup %2297 }
 0x8cb   :  { %v1190_v28 = vmul.f32 %v2298_v7, %v1172_v53  ;;  %v1191_v12 = vmul.f32 %v2298_v7, %v1183_v11 }
 0x8cd   :  { %v1200_v30 = vmul.f32 %v1196_v13, %v1190_v28  ;;  %v1206_v32 = vmul.f32 %v1196_v13, %v1191_v12 }
 0x8cf   :  { %v1208_v15 = vsub.f32 %v1157_v1, %v1206_v32  ;;  %v1202_v19 = vsub.f32 %v1151_v27, %v1200_v30 }
 0x8d1   :  { %v2726_v20 = vsel %vm1159_vm6, %v1190_v28, %v1202_v19  ;;  %v2730_v23 = vsel %vm1159_vm6, %v1191_v12, %v1208_v15  ;;  %vm1478_vm6 = vcmp.eq.s32.totalorder %v2528_v16, 12 }
 0x8d2   :  { %v1215_v24 = vsel %vm1212_vm8, %v2726_v20, 0.0  ;;  %v1226_v14 = vsel %vm1212_vm8, %v2730_v23, 0.0 }
 0x8d3   :  { %v1217_v25 = vsel %vm379_vm3, %v1215_v24, 0.0  ;;  %v1228_v34 = vsel %vm379_vm3, %v1226_v14, 0.0 }
 0x8d4   :  { %v1220_v26 = vrot.slane %v1217_v25, 4  ;;  %v1231_v57 = vrot.slane %v1228_v34, 4 }
 0x8d6   :  { %v1221_v29 = vadd.f32 %v1220_v26, %v1217_v25  ;;  %v1232_v18 = vadd.f32 %v1231_v57, %v1228_v34 }
 0x8d8   :  { %v1222_v1 = vrot.slane %v1221_v29, 2  ;;  %v1233_v50 = vrot.slane %v1232_v18, 2 }
 0x8da   :  { %v1223_v27 = vadd.f32 %v1222_v1, %v1221_v29  ;;  %v1234_v10 = vadd.f32 %v1233_v50, %v1232_v18 }
 0x8dc   :  { %v1224_v31 = vrot.slane %v1223_v27, 1  ;;  %v1235_v11 = vrot.slane %v1234_v10, 1 }
 0x8de   :  { %v1225_v36 = vadd.f32 %v1224_v31, %v1223_v27  ;;  %v1236_v7 = vadd.f32 %v1235_v11, %v1234_v10 }
 0x8e0   :  { %v1237_v37 = vsel %vm1214_vm9, %v1225_v36, 0.0 }
 0x8e1   :  { %v1238_v3 = vsel %vm379_vm3, %v1237_v37, 0.0 }
 0x8e2   :  { %1239 = vadd.xlane.f32.xlu1 %v1238_v3 }
 0x923   :  { %v1199_v38 = vpop.xlane.xlu0 %1198 }
 0x924   :  { %v1201_v39 = vmul.f32 %v1199_v38, %v1190_v28  ;;  %v1207_v42 = vmul.f32 %v1199_v38, %v1191_v12 }
 0x926   :  { %v1209_v49 = vsub.f32 %v2715_v8, %v1207_v42  ;;  %v1203_v53 = vsub.f32 %v1150_v51, %v1201_v39 }
 0x928   :  { %v1246_v48 = vsel %vm1214_vm9, %v1203_v53, 0.0 }
 0x929   :  { %v1250_v22 = vsel %vm379_vm3, %v1246_v48, 0.0 }
 0x92a   :  { %1251 = vadd.xlane.f32.xlu0 %v1250_v22 }
 0x96f   :  { %v1240_v54 = vpop.xlane.xlu1 %1239 }
 0x970   :  { %2299 = vrcp.f32 %v1240_v54 }
 0x97a   :  { %v2300_v55 = vpop.eup %2299 }
 0x97b   :  { %v2744_v56 = vmul.f32 %v2300_v55, %v1225_v36  ;;  %v2762_v28 = vmul.f32 %v2300_v55, %v1236_v7 }
 0x9b7   :  { %v1252_v58 = vpop.xlane.xlu0 %1251 }
 0x9b8   :  { %v1254_v9 = vmul.f32 %v1252_v58, %v2744_v56  ;;  %v1260_v12 = vmul.f32 %v1252_v58, %v2762_v28 }
 0x9ba   :  { %v1256_v59 = vsub.f32 %v1203_v53, %v1254_v9  ;;  %v1262_v13 = vsub.f32 %v1209_v49, %v1260_v12 }
 0x9bc   :  { %v1269_v5 = vsel %vm1266_vm10, %v1256_v59, 0.0  ;;  %v1299_v60 = vsel %vm1267_vm11, %v1256_v59, 0.0  ;;  %v1280_v30 = vsel %vm1266_vm10, %v1262_v13, 0.0 }
 0x9bd   :  { %v1303_v62 = vsel %vm379_vm3, %v1299_v60, 0.0  ;;  %v1271_v2 = vsel %vm379_vm3, %v1269_v5, 0.0  ;;  %v1282_v32 = vsel %vm379_vm3, %v1280_v30, 0.0 }
 0x9be   :  { %1304 = vadd.xlane.f32.xlu0 %v1303_v62  ;;  %v1273_v63 = vrot.slane %v1271_v2, 4  ;;  %v1284_v15 = vrot.slane %v1282_v32, 4  ;;  %v1245_v62 = vsel %vm1214_vm9, %v2726_v20, 0.0  ;;  %vm1532_vm9 = vcmp.eq.s32.totalorder %v2488_v46, 13 }
 0x9c0   :  { %v1274_v6 = vadd.f32 %v1273_v63, %v1271_v2  ;;  %v1285_v19 = vadd.f32 %v1284_v15, %v1282_v32  ;;  %v1247_v2 = vsel %vm379_vm3, %v1245_v62, 0.0 }
 0x9c2   :  { %v1275_v8 = vrot.slane %v1274_v6, 2  ;;  %v1286_v24 = vrot.slane %v1285_v19, 2 }
 0x9c4   :  { %v1276_v51 = vadd.f32 %v1275_v8, %v1274_v6  ;;  %v1287_v26 = vadd.f32 %v1286_v24, %v1285_v19 }
 0x9c6   :  { %v1277_v17 = vrot.slane %v1276_v51, 1  ;;  %v1288_v29 = vrot.slane %v1287_v26, 1 }
 0x9c8   :  { %v1278_v21 = vadd.f32 %v1277_v17, %v1276_v51  ;;  %v1289_v1 = vadd.f32 %v1288_v29, %v1287_v26 }
 0x9ca   :  { %v1290_v45 = vsel %vm1267_vm11, %v1278_v21, 0.0 }
 0x9cb   :  { %v1291_v61 = vsel %vm379_vm3, %v1290_v45, 0.0 }
 0x9cc   :  { %1292 = vadd.xlane.f32.xlu1 %v1291_v61 }
 0xa4b   :  { %v1305_v37 = vpop.xlane.xlu0 %1304 }
 0xa59   :  { %v1293_v25 = vpop.xlane.xlu1 %1292 }
 0xa5a   :  { %2301 = vrcp.f32 %v1293_v25 }
 0xa64   :  { %v2302_v27 = vpop.eup %2301 }
 0xa65   :  { %v2768_v31 = vmul.f32 %v2302_v27, %v1278_v21  ;;  %v2770_v36 = vmul.f32 %v2302_v27, %v1289_v1 }
 0xa67   :  { %v1307_v3 = vmul.f32 %v1305_v37, %v2768_v31  ;;  %v1313_v63 = vmul.f32 %v1305_v37, %v2770_v36 }
 0xa69   :  { %v1309_v38 = vsub.f32 %v1256_v59, %v1307_v3  ;;  %v1315_v6 = vsub.f32 %v1262_v13, %v1313_v63 }
 0xa6b   :  { %v1311_v39 = vsel %vm1266_vm10, %v2768_v31, %v1309_v38  ;;  %v1317_v8 = vsel %vm1266_vm10, %v2770_v36, %v1315_v6  ;;  %vm1584_vm10 = vcmp.eq.s32.totalorder %v2528_v16, 14 }
 0xa6c   :  { %v1352_v42 = vsel %vm1320_vm13, %v1311_v39, 0.0  ;;  %v1322_v49 = vsel %vm1319_vm12, %v1311_v39, 0.0  ;;  %v1333_v51 = vsel %vm1319_vm12, %v1317_v8, 0.0 }
 0xa6d   :  { %v1356_v53 = vsel %vm379_vm3, %v1352_v42, 0.0  ;;  %v1324_v48 = vsel %vm379_vm3, %v1322_v49, 0.0  ;;  %v1335_v17 = vsel %vm379_vm3, %v1333_v51, 0.0 }
 0xa6e   :  { %1357 = vadd.xlane.f32.xlu0 %v1356_v53  ;;  %v1326_v22 = vrot.slane %v1324_v48, 4  ;;  %v1337_v21 = vrot.slane %v1335_v17, 4 }
 0xa70   :  { %v1327_v54 = vadd.f32 %v1326_v22, %v1324_v48  ;;  %v1338_v45 = vadd.f32 %v1337_v21, %v1335_v17 }
 0xa72   :  { %v1328_v55 = vrot.slane %v1327_v54, 2  ;;  %v1339_v61 = vrot.slane %v1338_v45, 2 }
 0xa74   :  { %v1329_v58 = vadd.f32 %v1328_v55, %v1327_v54  ;;  %v1340_v34 = vadd.f32 %v1339_v61, %v1338_v45 }
 0xa76   :  { %v1330_v9 = vrot.slane %v1329_v58, 1  ;;  %v1341_v50 = vrot.slane %v1340_v34, 1 }
 0xa78   :  { %v1331_v59 = vadd.f32 %v1330_v9, %v1329_v58  ;;  %v1342_v12 = vadd.f32 %v1341_v50, %v1340_v34 }
 0xa7a   :  { %v1343_v5 = vsel %vm1320_vm13, %v1331_v59, 0.0 }
 0xa7b   :  { %v1344_v60 = vsel %vm379_vm3, %v1343_v5, 0.0 }
 0xa7c   :  { %1345 = vadd.xlane.f32.xlu1 %v1344_v60 }
 0xa80   :  { %1248 = vadd.xlane.f32.xlu1 %v1247_v2 }
 0xafb   :  { %v1358_v19 = vpop.xlane.xlu0 %1357 }
 0xb09   :  { %v1346_v14 = vpop.xlane.xlu1 %1345 }
 0xb0a   :  { %2303 = vrcp.f32 %v1346_v14 }
 0xb0d   :  { %v2798_v57 = vpop.xlane.xlu1 %1248 }
 0xb0e   :  { %v1253_v18 = vmul.f32 %v2798_v57, %v2744_v56 }
 0xb10   :  { %v1255_v10 = vsub.f32 %v2726_v20, %v1253_v18 }
 0xb12   :  { %v1257_v11 = vsel %vm1212_vm8, %v2744_v56, %v1255_v10 }
 0xb13   :  { %v1298_v7 = vsel %vm1267_vm11, %v1257_v11, 0.0  ;;  %vm1585_vm11 = vcmp.eq.s32.totalorder %v2488_v46, 14 }
 0xb14   :  { %v2304_v13 = vpop.eup %2303  ;;  %v1300_v30 = vsel %vm379_vm3, %v1298_v7, 0.0 }
 0xb15   :  { %1301 = vadd.xlane.f32.xlu0 %v1300_v30  ;;  %v2809_v32 = vmul.f32 %v2304_v13, %v1331_v59  ;;  %v2811_v15 = vmul.f32 %v2304_v13, %v1342_v12 }
 0xb17   :  { %v1360_v24 = vmul.f32 %v1358_v19, %v2809_v32  ;;  %v1366_v48 = vmul.f32 %v1358_v19, %v2811_v15 }
 0xb19   :  { %v1362_v20 = vsub.f32 %v1311_v39, %v1360_v24  ;;  %v1368_v54 = vsub.f32 %v1317_v8, %v1366_v48 }
 0xb1b   :  { %v1364_v56 = vsel %vm1319_vm12, %v2809_v32, %v1362_v20  ;;  %v1370_v9 = vsel %vm1319_vm12, %v2811_v15, %v1368_v54  ;;  %vm1637_vm12 = vcmp.eq.s32.totalorder %v2528_v16, 15 }
 0xb1c   :  { %v1375_v25 = vsel %vm1372_vm14, %v1364_v56, 0.0  ;;  %v1405_v26 = vsel %vm1373_vm15, %v1364_v56, 0.0  ;;  %v1386_v60 = vsel %vm1372_vm14, %v1370_v9, 0.0 }
 0xb1d   :  { %v1377_v29 = vsel %vm379_vm3, %v1375_v25, 0.0  ;;  %v1409_v1 = vsel %vm379_vm3, %v1405_v26, 0.0  ;;  %v1388_v62 = vsel %vm379_vm3, %v1386_v60, 0.0 }
 0xb1e   :  { %v1379_v27 = vrot.slane %v1377_v29, 4  ;;  %1410 = vadd.xlane.f32.xlu0 %v1409_v1  ;;  %v1390_v2 = vrot.slane %v1388_v62, 4 }
 0xb20   :  { %v1380_v37 = vadd.f32 %v1379_v27, %v1377_v29  ;;  %v1391_v63 = vadd.f32 %v1390_v2, %v1388_v62  ;;  %v1259_v29 = vmul.f32 %v2798_v57, %v2762_v28 }
 0xb22   :  { %v1381_v3 = vrot.slane %v1380_v37, 2  ;;  %v1392_v6 = vrot.slane %v1391_v63, 2  ;;  %v1261_v1 = vsub.f32 %v2730_v23, %v1259_v29 }
 0xb24   :  { %v1382_v38 = vadd.f32 %v1381_v3, %v1380_v37  ;;  %v1393_v8 = vadd.f32 %v1392_v6, %v1391_v63  ;;  %v1263_v37 = vsel %vm1212_vm8, %v2762_v28, %v1261_v1  ;;  %vm1531_vm8 = vcmp.eq.s32.totalorder %v2528_v16, 13 }
 0xb26   :  { %v1383_v39 = vrot.slane %v1382_v38, 1  ;;  %v1394_v51 = vrot.slane %v1393_v8, 1 }
 0xb28   :  { %v1384_v42 = vadd.f32 %v1383_v39, %v1382_v38  ;;  %v1395_v17 = vadd.f32 %v1394_v51, %v1393_v8 }
 0xb2a   :  { %v1396_v49 = vsel %vm1373_vm15, %v1384_v42, 0.0 }
 0xb2b   :  { %v1397_v53 = vsel %vm379_vm3, %v1396_v49, 0.0 }
 0xb2c   :  { %1398 = vadd.xlane.f32.xlu1 %v1397_v53 }
 0xba2   :  { %v1302_v22 = vpop.xlane.xlu0 %1301 }
 0xba3   :  { %v1306_v55 = vmul.f32 %v1302_v22, %v2768_v31  ;;  %v1312_v27 = vmul.f32 %v1302_v22, %v2770_v36 }
 0xba5   :  { %v1308_v58 = vsub.f32 %v1257_v11, %v1306_v55  ;;  %v1314_v38 = vsub.f32 %v1263_v37, %v1312_v27 }
 0xba7   :  { %v1351_v59 = vsel %vm1320_vm13, %v1308_v58, 0.0  ;;  %vm1638_vm13 = vcmp.eq.s32.totalorder %v2488_v46, 15 }
 0xba8   :  { %v1353_v5 = vsel %vm379_vm3, %v1351_v59, 0.0 }
 0xba9   :  { %1354 = vadd.xlane.f32.xlu1 %v1353_v5 }
 0xbab   :  { %v1411_v14 = vpop.xlane.xlu0 %1410 }
 0xbb9   :  { %v1399_v31 = vpop.xlane.xlu1 %1398 }
 0xbba   :  { %2305 = vrcp.f32 %v1399_v31 }
 0xbc4   :  { %v2306_v21 = vpop.eup %2305 }
 0xbc5   :  { %v2839_v45 = vmul.f32 %v2306_v21, %v1384_v42  ;;  %v2841_v61 = vmul.f32 %v2306_v21, %v1395_v17 }
 0xbc7   :  { %v1413_v34 = vmul.f32 %v1411_v14, %v2839_v45  ;;  %v1419_v36 = vmul.f32 %v1411_v14, %v2841_v61 }
 0xbc9   :  { %v1415_v18 = vsub.f32 %v1364_v56, %v1413_v34  ;;  %v1421_v48 = vsub.f32 %v1370_v9, %v1419_v36 }
 0xbcb   :  { %v1417_v50 = vsel %vm1372_vm14, %v2839_v45, %v1415_v18  ;;  %v1423_v47 = vsel %vm1372_vm14, %v2841_v61, %v1421_v48 }
 0xbcc   :  { %v1458_v10 = vsel %vm1426_vm5, %v1417_v50, 0.0  ;;  %v1428_v11 = vsel %vm1425_vm4, %v1417_v50, 0.0  ;;  %v1439_v28 = vsel %vm1425_vm4, %v1423_v47, 0.0 }
 0xbcd   :  { %v1462_v7 = vsel %vm379_vm3, %v1458_v10, 0.0  ;;  %v1430_v12 = vsel %vm379_vm3, %v1428_v11, 0.0 }
 0xbce   :  { %1463 = vadd.xlane.f32.xlu1 %v1462_v7  ;;  %v1432_v13 = vrot.slane %v1430_v12, 4 }
 0xbd0   :  { %v1433_v30 = vadd.f32 %v1432_v13, %v1430_v12 }
 0xbd2   :  { %v1434_v19 = vrot.slane %v1433_v30, 2 }
 0xbd4   :  { %v1435_v24 = vadd.f32 %v1434_v19, %v1433_v30 }
 0xbd6   :  { %v1436_v20 = vrot.slane %v1435_v24, 1 }
 0xbd8   :  { %v1437_v56 = vadd.f32 %v1436_v20, %v1435_v24 }
 0xbda   :  { %v1449_v25 = vsel %vm1426_vm5, %v1437_v56, 0.0 }
 0xbdb   :  { %v1450_v26 = vsel %vm379_vm3, %v1449_v25, 0.0 }
 0xbdc   :  { %1451 = vadd.xlane.f32.xlu0 %v1450_v26  ;;  %v42_v26 = vld [vmem:[%s3070_s0 + $0x8] sm:$0xff] }
 0xbdd   :  { %2160 = vmatmul.mubr.msk.f32.gmra.mrb[2].mxu0 %vm48_vm1, %v42_v26 }
 0xbde   :  { %2162 = vmatprep.mubr.msk.f32.mxu0 %vm2318_vm0, %v2319_v4 }
 0xc36   :  { %v1355_v3 = vpop.xlane.xlu1 %1354 }
 0xc37   :  { %v1359_v39 = vmul.f32 %v1355_v3, %v2809_v32  ;;  %v1365_v42 = vmul.f32 %v1355_v3, %v2811_v15  ;;  %v1441_v32 = vsel %vm379_vm3, %v1439_v28, 0.0 }
 0xc38   :  { %v1443_v15 = vrot.slane %v1441_v32, 4 }
 0xc39   :  { %v2867_v49 = vsub.f32 %v1314_v38, %v1365_v42  ;;  %v1361_v53 = vsub.f32 %v1308_v58, %v1359_v39 }
 0xc3a   :  { %v1444_v22 = vadd.f32 %v1443_v15, %v1441_v32 }
 0xc3b   :  { %v1404_v57 = vsel %vm1373_vm15, %v1361_v53, 0.0 }
 0xc3c   :  { %v1406_v23 = vsel %vm379_vm3, %v1404_v57, 0.0  ;;  %v1445_v54 = vrot.slane %v1444_v22, 2 }
 0xc3d   :  { %1407 = vadd.xlane.f32.xlu0 %v1406_v23 }
 0xc3e   :  { %v1446_v58 = vadd.f32 %v1445_v54, %v1444_v22 }
 0xc40   :  { %v1447_v59 = vrot.slane %v1446_v58, 1 }
 0xc42   :  { %v1448_v5 = vadd.f32 %v1447_v59, %v1446_v58 }
 0xc5b   :  { %v1464_v2 = vpop.xlane.xlu1 %1463 }
 0xc69   :  { %v1452_v55 = vpop.xlane.xlu0 %1451 }
 0xc6a   :  { %2307 = vrcp.f32 %v1452_v55 }
 0xc74   :  { %v2308_v60 = vpop.eup %2307 }
 0xc75   :  { %v2879_v62 = vmul.f32 %v2308_v60, %v1437_v56  ;;  %v2881_v9 = vmul.f32 %v2308_v60, %v1448_v5 }
 0xc77   :  { %v1466_v63 = vmul.f32 %v1464_v2, %v2879_v62 }
 0xc79   :  { %v1468_v6 = vsub.f32 %v1417_v50, %v1466_v63 }
 0xc7b   :  { %v1470_v31 = vsel %vm1425_vm4, %v2879_v62, %v1468_v6 }
 0xc7c   :  { %v1511_v8 = vsel %vm1479_vm7, %v1470_v31, 0.0  ;;  %v1481_v51 = vsel %vm1478_vm6, %v1470_v31, 0.0 }
 0xc7d   :  { %v1515_v17 = vsel %vm379_vm3, %v1511_v8, 0.0  ;;  %v1483_v21 = vsel %vm379_vm3, %v1481_v51, 0.0 }
 0xc7e   :  { %1516 = vadd.xlane.f32.xlu0 %v1515_v17  ;;  %v1485_v14 = vrot.slane %v1483_v21, 4 }
 0xc80   :  { %v1486_v34 = vadd.f32 %v1485_v14, %v1483_v21  ;;  %v468_v21 = vld [vmem:[%s3076_s3] sm:$0xf] }
 0xc81   :  { %v469_v14 = vunpack.c.l.bf16 %v468_v21 }
 0xc82   :  { %v1487_v18 = vrot.slane %v1486_v34, 2 }
 0xc84   :  { %v1488_v50 = vadd.f32 %v1487_v18, %v1486_v34 }
 0xc86   :  { %v1489_v10 = vrot.slane %v1488_v50, 1 }
 0xc88   :  { %v1490_v11 = vadd.f32 %v1489_v10, %v1488_v50 }
 0xc8a   :  { %v1502_v7 = vsel %vm1479_vm7, %v1490_v11, 0.0 }
 0xc8b   :  { %v1503_v12 = vsel %vm379_vm3, %v1502_v7, 0.0 }
 0xc8c   :  { %1504 = vadd.xlane.f32.xlu1 %v1503_v12 }
 0xcca   :  { %v1408_v13 = vpop.xlane.xlu0 %1407 }
 0xccb   :  { %v1412_v30 = vmul.f32 %v1408_v13, %v2839_v45  ;;  %v2900_v19 = vmul.f32 %v1408_v13, %v2841_v61  ;;  %v43_v45 = vld [vmem:[%s3070_s0 + $0x10] sm:$0xff]  ;;  %v1472_v61 = vmul.f32 %v1464_v2, %v2881_v9  ;;  %v129_v13 = vpop.f32.mrb[2].mxu0 }
 0xccc   :  { %2163 = vmatmul.mubr.msk.f32.gmra.mrb[4].mxu0 %vm48_vm1, %v43_v45 }
 0xccd   :  { %v1420_v24 = vsub.f32 %v2867_v49, %v2900_v19  ;;  %v1414_v20 = vsub.f32 %v1361_v53, %v1412_v30  ;;  %2201 = vmatprep.mubr.msk.f32.mxu0 %vm2318_vm0, %v2319_v4  ;;  %v1474_v29 = vsub.f32 %v1423_v47, %v1472_v61  ;;  %v2161_v30 = vpop.f32.mrb[3].mxu0  ;;  %v544_v61 = vld [vmem:[%s3077_s4] sm:$0xf] }
 0xccf   :  { %v1457_v56 = vsel %vm1426_vm5, %v1414_v20, 0.0  ;;  %v1476_v1 = vsel %vm1425_vm4, %v2881_v9, %v1474_v29 }
 0xcd0   :  { %v1459_v25 = vsel %vm379_vm3, %v1457_v56, 0.0  ;;  %v1492_v27 = vsel %vm1478_vm6, %v1476_v1, 0.0  ;;  %2202 = vmatmul.mubr.msk.f32.vlgmr.msra.gmra.mrb[6].mxu0 %vm138_vm2, %v469_v14 }
 0xcd1   :  { %1460 = vadd.xlane.f32.xlu1 %v1459_v25  ;;  %v1494_v37 = vsel %vm379_vm3, %v1492_v27, 0.0  ;;  %2206 = vmatprep.mubr.msk.f32.mxu0 %vm2318_vm0, %v2319_v4  ;;  %v627_v27 = vld [vmem:[%s3078_s8 + $0x8] sm:$0xff] }
 0xcd2   :  { %v1496_v3 = vrot.slane %v1494_v37, 4 }
 0xcd4   :  { %v1497_v38 = vadd.f32 %v1496_v3, %v1494_v37  ;;  %v545_v37 = vunpack.c.l.bf16 %v544_v61 }
 0xcd6   :  { %v1498_v39 = vrot.slane %v1497_v38, 2 }
 0xcd8   :  { %v1499_v53 = vadd.f32 %v1498_v39, %v1497_v38 }
 0xcda   :  { %v1500_v57 = vrot.slane %v1499_v53, 1 }
 0xcdc   :  { %v1501_v23 = vadd.f32 %v1500_v57, %v1499_v53 }
 0xd0b   :  { %v1517_v28 = vpop.xlane.xlu0 %1516 }
 0xd19   :  { %v1505_v42 = vpop.xlane.xlu1 %1504 }
 0xd1a   :  { %2309 = vrcp.f32 %v1505_v42 }
 0xd24   :  { %v2310_v36 = vpop.eup %2309 }
 0xd25   :  { %v2926_v48 = vmul.f32 %v2310_v36, %v1490_v11  ;;  %v2928_v47 = vmul.f32 %v2310_v36, %v1501_v23 }
 0xd27   :  { %v1519_v32 = vmul.f32 %v1517_v28, %v2926_v48  ;;  %v1525_v15 = vmul.f32 %v1517_v28, %v2928_v47 }
 0xd29   :  { %v1521_v22 = vsub.f32 %v1470_v31, %v1519_v32  ;;  %v1527_v54 = vsub.f32 %v1476_v1, %v1525_v15  ;;  %v626_v1 = vld [vmem:[%s3078_s8] sm:$0xff] }
 0xd2a   :  { %v2268_v38 = vpack.c.bf16 %v627_v27, %v626_v1 }
 0xd2b   :  { %v2936_v55 = vsel %vm1478_vm6, %v2926_v48, %v1521_v22  ;;  %v2941_v58 = vsel %vm1478_vm6, %v2928_v47, %v1527_v54 }
 0xd2c   :  { %v1534_v59 = vsel %vm1531_vm8, %v2936_v55, 0.0  ;;  %v1564_v7 = vsel %vm1532_vm9, %v2936_v55, 0.0 }
 0xd2d   :  { %v1536_v5 = vsel %vm379_vm3, %v1534_v59, 0.0  ;;  %v1568_v12 = vsel %vm379_vm3, %v1564_v7, 0.0 }
 0xd2e   :  { %v1538_v60 = vrot.slane %v1536_v5, 4 }
 0xd30   :  { %v1539_v2 = vadd.f32 %v1538_v60, %v1536_v5 }
 0xd32   :  { %v1540_v63 = vrot.slane %v1539_v2, 2 }
 0xd34   :  { %v1541_v6 = vadd.f32 %v1540_v63, %v1539_v2 }
 0xd36   :  { %v1542_v31 = vrot.slane %v1541_v6, 1 }
 0xd38   :  { %v1543_v8 = vadd.f32 %v1542_v31, %v1541_v6 }
 0xd3a   :  { %v1555_v51 = vsel %vm1532_vm9, %v1543_v8, 0.0 }
 0xd3b   :  { %v1556_v17 = vsel %vm379_vm3, %v1555_v51, 0.0 }
 0xd3c   :  { %1557 = vadd.xlane.f32.xlu1 %v1556_v17 }
 0xd4d   :  { %547 = vrot.lane.b32.xlu1 %v2476_v41, %s2320_s14  ;;  %v1545_v41 = vsel %vm1531_vm8, %v2941_v58, 0.0 }
 0xd5e   :  { %v1461_v34 = vpop.xlane.xlu1 %1460 }
 0xd5f   :  { %v1465_v18 = vmul.f32 %v1461_v34, %v2879_v62  ;;  %v1547_v62 = vsel %vm379_vm3, %v1545_v41, 0.0  ;;  %v1471_v36 = vmul.f32 %v1461_v34, %v2881_v9 }
 0xd61   :  { %v1467_v50 = vsub.f32 %v1414_v20, %v1465_v18  ;;  %v1549_v20 = vrot.slane %v1547_v62, 4  ;;  %v1473_v32 = vsub.f32 %v1420_v24, %v1471_v36 }
 0xd63   :  { %v1510_v10 = vsel %vm1479_vm7, %v1467_v50, 0.0  ;;  %v1550_v26 = vadd.f32 %v1549_v20, %v1547_v62 }
 0xd64   :  { %v1512_v11 = vsel %vm379_vm3, %v1510_v10, 0.0 }
 0xd65   :  { %1513 = vadd.xlane.f32.xlu0 %v1512_v11  ;;  %v1551_v45 = vrot.slane %v1550_v26, 2 }
 0xd67   :  { %v1552_v3 = vadd.f32 %v1551_v45, %v1550_v26 }
 0xd69   :  { %1569 = vadd.xlane.f32.xlu0 %v1568_v12  ;;  %v1553_v42 = vrot.slane %v1552_v3, 1 }
 0xd6b   :  { %v1554_v53 = vadd.f32 %v1553_v42, %v1552_v3 }
 0xd9f   :  { %v133_v56 = vpop.f32.mrb[4].mxu0 }
 0xda0   :  { %v2164_v25 = vpop.f32.mrb[5].mxu0 }
 0xda3   :  { %v539_v10 = vpop.f32.mrb[6].mxu0 }
 0xda4   :  { %v2203_v11 = vpop.f32.mrb[7].mxu0 }
 0xdc9   :  { %v1558_v29 = vpop.xlane.xlu1 %1557 }
 0xdca   :  { %2311 = vrcp.f32 %v1558_v29 }
 0xdcd   :  { %v548_v39 = vpop.permute.xlu1 %547 }
 0xdce   :  { %2205 = vmatpush3.msra.mxu0 %v548_v39 }
 0xdcf   :  { %2207 = vmatmul.mubr.msk.f32.vlgmr.msra.gmra.mrb[8].mxu0 %vm138_vm2, %v545_v37  ;;  %2267 = vmatprep.subr.bf16.mxu0 %v2317_v0  ;;  %v543_v37 = vmax.f32 %v539_v10, 0.0 }
 0xdd0   :  { %2269 = vmatpush3.bf16.msra.mxu0 %v2268_v38  ;;  %2213 = vmatprep.mubr.msk.f32.mxu0 %vm2318_vm0, %v2319_v4 }
 0xdd1   :  { %2271 = vmatprep.subr.bf16.mxu0 %v2497_v52 }
 0xdd4   :  { %v2312_v57 = vpop.eup %2311 }
 0xdd5   :  { %v1562_v23 = vmul.f32 %v2312_v57, %v1554_v53  ;;  %v1561_v59 = vmul.f32 %v2312_v57, %v1543_v8 }
 0xdf2   :  { %v1514_v28 = vpop.xlane.xlu0 %1513 }
 0xdf3   :  { %v1518_v15 = vmul.f32 %v1514_v28, %v2926_v48  ;;  %v1524_v22 = vmul.f32 %v1514_v28, %v2928_v47 }
 0xdf5   :  { %v1526_v54 = vsub.f32 %v1473_v32, %v1524_v22  ;;  %v1520_v5 = vsub.f32 %v1467_v50, %v1518_v15 }
 0xdf6   :  { %v1570_v60 = vpop.xlane.xlu0 %1569 }
 0xdf7   :  { %v1572_v2 = vmul.f32 %v1570_v60, %v1561_v59  ;;  %v1578_v63 = vmul.f32 %v1570_v60, %v1562_v23  ;;  %v1563_v6 = vsel %vm1532_vm9, %v1520_v5, 0.0 }
 0xdf8   :  { %v1565_v9 = vsel %vm379_vm3, %v1563_v6, 0.0 }
 0xdf9   :  { %v1574_v31 = vsub.f32 %v2936_v55, %v1572_v2  ;;  %v1580_v49 = vsub.f32 %v2941_v58, %v1578_v63  ;;  %1566 = vadd.xlane.f32.xlu0 %v1565_v9 }
 0xdfb   :  { %v1576_v19 = vsel %vm1531_vm8, %v1561_v59, %v1574_v31  ;;  %v1582_v24 = vsel %vm1531_vm8, %v1562_v23, %v1580_v49 }
 0xdfc   :  { %v1587_v48 = vsel %vm1584_vm10, %v1576_v19, 0.0  ;;  %v1617_v18 = vsel %vm1585_vm11, %v1576_v19, 0.0  ;;  %v1598_v30 = vsel %vm1584_vm10, %v1582_v24, 0.0 }
 0xdfd   :  { %v1589_v47 = vsel %vm379_vm3, %v1587_v48, 0.0  ;;  %v1621_v50 = vsel %vm379_vm3, %v1617_v18, 0.0  ;;  %v1600_v25 = vsel %vm379_vm3, %v1598_v30, 0.0 }
 0xdfe   :  { %v1591_v8 = vrot.slane %v1589_v47, 4  ;;  %v1602_v26 = vrot.slane %v1600_v25, 4 }
 0xe00   :  { %v1592_v51 = vadd.f32 %v1591_v8, %v1589_v47  ;;  %v1603_v45 = vadd.f32 %v1602_v26, %v1600_v25 }
 0xe02   :  { %v1593_v17 = vrot.slane %v1592_v51, 2  ;;  %v1604_v61 = vrot.slane %v1603_v45, 2 }
 0xe04   :  { %v1594_v55 = vadd.f32 %v1593_v17, %v1592_v51  ;;  %v1605_v1 = vadd.f32 %v1604_v61, %v1603_v45 }
 0xe06   :  { %v1595_v21 = vrot.slane %v1594_v55, 1  ;;  %v1606_v27 = vrot.slane %v1605_v1, 1 }
 0xe08   :  { %v1596_v58 = vadd.f32 %v1595_v21, %v1594_v55  ;;  %v1607_v38 = vadd.f32 %v1606_v27, %v1605_v1 }
 0xe0a   :  { %v1608_v14 = vsel %vm1585_vm11, %v1596_v58, 0.0 }
 0xe0b   :  { %v1609_v34 = vsel %vm379_vm3, %v1608_v14, 0.0 }
 0xe0c   :  { %1610 = vadd.xlane.f32.xlu0 %v1609_v34 }
 0xe10   :  { %1622 = vadd.xlane.f32.xlu0 %v1621_v50 }
 0xe86   :  { %v1567_v7 = vpop.xlane.xlu0 %1566 }
 0xe87   :  { %v1571_v12 = vmul.f32 %v1567_v7, %v1561_v59  ;;  %v1577_v41 = vmul.f32 %v1567_v7, %v1562_v23 }
 0xe89   :  { %v3007_v62 = vsub.f32 %v1526_v54, %v1577_v41  ;;  %v1573_v13 = vsub.f32 %v1520_v5, %v1571_v12 }
 0xe8b   :  { %v1616_v20 = vsel %vm1585_vm11, %v1573_v13, 0.0 }
 0xe8c   :  { %v1618_v56 = vsel %vm379_vm3, %v1616_v20, 0.0 }
 0xe8d   :  { %1619 = vadd.xlane.f32.xlu0 %v1618_v56 }
 0xe99   :  { %v1611_v29 = vpop.xlane.xlu0 %1610 }
 0xe9a   :  { %2313 = vrcp.f32 %v1611_v29 }
 0xe9d   :  { %v1623_v28 = vpop.xlane.xlu0 %1622 }
 0xea2   :  { %v619_v3 = vpop.f32.mrb[8].mxu0 }
 0xea3   :  { %v623_v39 = vmax.f32 %v619_v3, 0.0  ;;  %v2208_v42 = vpop.f32.mrb[9].mxu0 }
 0xea4   :  { %v2314_v53 = vpop.eup %2313 }
 0xea5   :  { %v1614_v57 = vmul.f32 %v2314_v53, %v1596_v58  ;;  %v1615_v23 = vmul.f32 %v2314_v53, %v1607_v38  ;;  %v624_v36 = vadd.f32 %v623_v39, %v543_v37  ;;  %v1763_v53 = vmul.f32 0.5, %v2465_v35  ;;  %v1921_v35 = vld [vmem:[%s3079_s5] sm:$0xf] }
 0xea7   :  { %v1625_v32 = vmul.f32 %v1623_v28, %v1614_v57  ;;  %v1631_v15 = vmul.f32 %v1623_v28, %v1615_v23  ;;  %v625_v22 = vmul.f32 0.5, %v624_v36  ;;  %v1922_v36 = vunpack.c.l.bf16 %v1921_v35 }
 0xea9   :  { %v1627_v54 = vsub.f32 %v1576_v19, %v1625_v32  ;;  %v1633_v59 = vsub.f32 %v1582_v24, %v1631_v15  ;;  %2214 = vmatmul.mubr.msk.f32.vlgmr.msra.gmra.mrb[10].mxu0 %vm379_vm3, %v625_v22 }
 0xeaa   :  { %2273 = vmatpush3.bf16.msra.mxu0 %v2497_v52 }
 0xeab   :  { %v1629_v5 = vsel %vm1584_vm10, %v1614_v57, %v1627_v54  ;;  %v1635_v60 = vsel %vm1584_vm10, %v1615_v23, %v1633_v59 }
 0xeac   :  { %v1640_v2 = vsel %vm1637_vm12, %v1629_v5, 0.0  ;;  %v1669_v14 = vsel %vm1638_vm13, %v1629_v5, 0.0  ;;  %v1651_v10 = vsel %vm1637_vm12, %v1635_v60, 0.0  ;;  %v2090_v5 = vld [vmem:[%s3080_s9] ss:$0 sm:$0xff] }
 0xead   :  { %v1642_v63 = vsel %vm379_vm3, %v1640_v2, 0.0  ;;  %v1673_v34 = vsel %vm379_vm3, %v1669_v14, 0.0  ;;  %v1653_v11 = vsel %vm379_vm3, %v1651_v10, 0.0 }
 0xeae   :  { %v1644_v6 = vrot.slane %v1642_v63, 4  ;;  %v1655_v7 = vrot.slane %v1653_v11, 4 }
 0xeb0   :  { %v1645_v9 = vadd.f32 %v1644_v6, %v1642_v63  ;;  %v1656_v12 = vadd.f32 %v1655_v7, %v1653_v11 }
 0xeb2   :  { %v1646_v31 = vrot.slane %v1645_v9, 2 }
 0xeb4   :  { %v1647_v49 = vadd.f32 %v1646_v31, %v1645_v9 }
 0xeb6   :  { %v1648_v19 = vrot.slane %v1647_v49, 1 }
 0xeb8   :  { %v1649_v24 = vadd.f32 %v1648_v19, %v1647_v49 }
 0xeba   :  { %v1661_v52 = vsel %vm1638_vm13, %v1649_v24, 0.0 }
 0xebb   :  { %v1662_v48 = vsel %vm379_vm3, %v1661_v52, 0.0 }
 0xebc   :  { %1663 = vadd.xlane.f32.xlu1 %v1662_v48 }
 0xf1a   :  { %v1620_v47 = vpop.xlane.xlu0 %1619 }
 0xf1b   :  { %v1624_v8 = vmul.f32 %v1620_v47, %v1614_v57  ;;  %v1630_v51 = vmul.f32 %v1620_v47, %v1615_v23 }
 0xf1d   :  { %v1632_v17 = vsub.f32 %v3007_v62, %v1630_v51  ;;  %v1626_v55 = vsub.f32 %v1573_v13, %v1624_v8  ;;  %v1657_v62 = vrot.slane %v1656_v12, 2 }
 0xf1f   :  { %v1668_v21 = vsel %vm1638_vm13, %v1626_v55, 0.0  ;;  %v1658_v13 = vadd.f32 %v1657_v62, %v1656_v12 }
 0xf20   :  { %v1670_v58 = vsel %vm379_vm3, %v1668_v21, 0.0 }
 0xf21   :  { %1671 = vadd.xlane.f32.xlu0 %v1670_v58  ;;  %v1659_v30 = vrot.slane %v1658_v13, 1 }
 0xf23   :  { %v1660_v56 = vadd.f32 %v1659_v30, %v1658_v13 }
 0xf25   :  { %1674 = vadd.xlane.f32.xlu0 %v1673_v34 }
 0xf49   :  { %v1664_v41 = vpop.xlane.xlu1 %1663 }
 0xf4a   :  { %2315 = vrcp.f32 %v1664_v41 }
 0xf54   :  { %v2316_v20 = vpop.eup %2315 }
 0xf55   :  { %v1667_v25 = vmul.f32 %v2316_v20, %v1660_v56 }
 0xf7c   :  { %v698_v18 = vpop.f32.mrb[10].mxu0 }
 0xf7d   :  { %v3029_v46 = vadd.f32 %v698_v18, %v2462_v33  ;;  %v2215_v50 = vpop.f32.mrb[11].mxu0 }
 0xfae   :  { %v1672_v26 = vpop.xlane.xlu0 %1671 }
 0xfaf   :  { %v1676_v45 = vmul.f32 %v1672_v26, %v1667_v25 }
 0xfb1   :  { %v1678_v33 = vsub.f32 %v1632_v17, %v1676_v45 }
 0xfb2   :  { %v1675_v61 = vpop.xlane.xlu0 %1674 }
 0xfb3   :  { %v1677_v29 = vmul.f32 %v1675_v61, %v1667_v25  ;;  %2225 = vmatprep.mubr.msk.f32.mxu0 %vm379_vm3, %v1678_v33 }
 0xfb5   :  { %v1679_v1 = vsub.f32 %v1635_v60, %v1677_v29  ;;  %v708_v60 = vadd.f32 %v2090_v5, %v3029_v46 }
 0xfb7   :  { %v1681_v27 = vsel %vm1637_vm12, %v1667_v25, %v1679_v1 }
 0xfb8   :  { %2226 = vmatmul.mubr.msk.f32.vlgmr.msra.gmra.mrb[12].mxu0 %vm379_vm3, %v1681_v27 }
 0xfb9   :  { %2237 = vmatprep.mubr.msk.f32.mxu0 %vm138_vm2, %v2478_v43 }
0x108b   :  { %v2227_v37 = vpop.f32.mrb[12].mxu0 }
0x108c   :  { %v1754_v3 = vpop.f32.mrb[13].mxu0 }
0x108d   :  { %v2275_v38 = vpack.c.bf16 %v2227_v37, %v1754_v3 }
0x108f   :  { %2276 = vmatpush3.bf16.msra.mxu1 %v2275_v38 }
0x1090   :  { %2240 = vmatprep.subr.mxu1 %v2319_v4 }
0x1092   :  { %2233 = vmatmul.mubr.msk.f32.vlgmr.msra.gmra.mrb[14].mxu1 %vm379_vm3, %v2470_v40 }
0x1093   :  { %2242 = vmatprep.mubr.msk.f32.mxu1 %vm2318_vm0, %v2319_v4 }
0x1165   :  { %v1832_v39 = vpop.f32.mrb[14].mxu1 }
0x1166   :  { %v1836_v16 = vmul.f32 0.25, %v1832_v39  ;;  %v2234_v42 = vpop.f32.mrb[15].mxu1 }
0x1168   :  { %1838 = vrot.lane.b32.xlu0 %v1836_v16, %s2321_s1 }
0x11da   :  { %v1839_v43 = vpop.permute.xlu0 %1838 }
0x11db   :  { %v1841_v57 = vsub.f32 %v1763_v53, %v1839_v43 }
0x11dd   :  { %1843 = vrot.lane.b32.xlu0 %v1841_v57, %s2320_s14 }
0x124f   :  { %v1844_v23 = vpop.permute.xlu0 %1843 }
0x1250   :  { %2235 = vmatprep.subr.mxu0 %v1844_v23  ;;  %2241 = vmatpush3.msra.mxu1 %v1844_v23 }
0x1251   :  { %2236 = vmatpush3.msra.mxu0 %v1844_v23  ;;  %2243 = vmatmul.mubr.msk.f32.vlgmr.msra.gmra.mrb[16].mxu1 %vm138_vm2, %v1922_v36 }
0x1252   :  { %2238 = vmatmul.mubr.msk.f32.vlgmr.msra.gmra.mrb[14].mxu0 %vm138_vm2, %v2482_v44  ;;  %2277 = vmatprep.subr.bf16.mxu0 %v2317_v0 }
0x1253   :  { %2249 = vmatprep.mubr.msk.f32.mxu0 %vm2318_vm0, %v2319_v4 }
0x1324   :  { %v1992_v44 = vpop.f32.mrb[16].mxu1 }
0x1325   :  { %v2239_v28 = vpop.f32.mrb[14].mxu0  ;;  %v2244_v22 = vpop.f32.mrb[17].mxu1  ;;  %v1996_v0 = vmul.f32 -0.25, %v1992_v44 }
0x1326   :  { %v1912_v32 = vpop.f32.mrb[15].mxu0 }
0x1327   :  { %v2278_v15 = vpack.c.bf16 %v2239_v28, %v1912_v32 }
0x1329   :  { %2279 = vmatpush3.bf16.msra.mxu0 %v2278_v15 }
0x132c   :  { %2250 = vmatmul.mubr.msk.f32.vlgmr.msra.gmra.mrb[16].mxu0 %vm379_vm3, %v2470_v40 }
0x13ff   :  { %v2063_v54 = vpop.f32.mrb[16].mxu0 }
0x1400   :  { %v2064_v59 = vadd.f32 %v2063_v54, %v1996_v0  ;;  %v2251_v4 = vpop.f32.mrb[17].mxu0 }
0x1402   :  { %2068 = vrot.lane.b32.xlu0 %v2064_v59, %s2321_s1 }
0x1474   :  { %v2069_v2 = vpop.permute.xlu0 %2068 }
0x1475   :  { %v2071_v63 = vsel %vm379_vm3, %v708_v60, %v2069_v2 }
0x1476   :  { %v2072_v6 = vsel %vm48_vm1, %v2071_v63, 0.0 }
0x1477   :  { %2073 = vst [vmem:[%s3081_s12] sm:$0xff] %v2072_v6 }

</bundles_post_ra>
